<compile_context>
chip_gen: v7x
topology: tpu7x:2x2x1
jax: 0.10.0
libtpu: 0.0.40
codegen_flags: <defaults>
</compile_context>

<pallas_src>
import functools

import jax
import jax.numpy as jnp
import numpy as np
from jax import lax
from jax.experimental import pallas as pl
from jax.experimental.pallas import tpu as pltpu

EPS = 1e-5


# ------------------------------ Pallas kernel ------------------------------ #

def _make_gcm_kernel(H, W, Cin, Cs, Cout, k0, k1, bt, compute_dtype):
    """Fused whole-module kernel for a fixed spatial/channel/batch-tile config."""
    HW = H * W
    N = bt * HW                              # pixels per grid step (lane axis)
    pad0 = (k0 - 1) // 2
    pad1 = (k1 - 1) // 2
    pfmax = max(pad0 * W, pad1)              # max flat-pixel shift reach
    L = ((pfmax + 127) // 128) * 128 if pfmax > 0 else 0   # lane-aligned left pad
    kmax = max(k0, k1)
    spad_w = L + HW + pfmax                  # padded per-image scratch width

    def kernel(x_ref,
               wsq_l1, a_sq_l1, wcv_l1, a_cv_l1,
               wsq_l2, a_sq_l2, wcv_l2, a_cv_l2,
               wsq_r1, a_sq_r1, wcv_r1, a_cv_r1,
               wsq_r2, a_sq_r2, wcv_r2, a_cv_r2,
               o_ref, spad_ref, t_ref):
        f32 = jnp.float32

        # ---- once per grid step (not per stage; never gated on program_id) ----
        if pfmax > 0:
            spad_ref[:, pl.ds(0, L)] = jnp.zeros((Cs, L), compute_dtype)
            spad_ref[:, pl.ds(L + HW, pfmax)] = jnp.zeros((Cs, pfmax),
                                                          compute_dtype)

        # column-validity masks for the (1, k1) taps, shared by l2 and r1
        col = lax.broadcasted_iota(jnp.int32, (1, HW), 1) % W
        masks1 = [
            jnp.logical_and(col + (k - pad1) >= 0,
                            col + (k - pad1) < W).astype(compute_dtype)
            for k in range(k1)
        ]

        def stage(inp, wsq_ref, asq_ref, wcv_ref, acv_ref,
                  stride, pad, K, masks):
            # 1x1 squeeze conv + folded BN affine + ReLU -> (Cs, N), stays in VMEM
            asq = asq_ref[...]
            s = jnp.dot(wsq_ref[...], inp.astype(compute_dtype),
                        preferred_element_type=f32)
            s = jnp.maximum(s * asq[:, 0:1] + asq[:, 1:2], 0.0)
            s = s.astype(compute_dtype)

            # build im2col taps T (K*Cs, N): per image, stage the squeezed map
            # in the zero-padded scratch, then copy the K shifted windows side
            # by side.  All offsets are static; pad bands stay zero across
            # stages/images (only the centre is ever overwritten).
            for b in range(bt):
                spad_ref[:, pl.ds(L, HW)] = s[:, b * HW:(b + 1) * HW]
                for k in range(K):
                    tap = spad_ref[:, pl.ds(L + (k - pad) * stride, HW)]
                    if masks is not None:
                        # zero taps that would wrap across image rows
                        tap = tap * masks[k]
                    t_ref[pl.ds(k * Cs, Cs), pl.ds(b * HW, HW)] = tap

            # single fused tap matmul (contraction depth K*Cs) + BN + ReLU
            acv = acv_ref[...]
            y = jnp.dot(wcv_ref[...], t_ref[pl.ds(0, K * Cs), :],
                        preferred_element_type=f32)
            return jnp.maximum(y * acv[:, 0:1] + acv[:, 1:2], 0.0)  # (Cout, N)

        # input (bt, Cin, HW) -> (Cin, bt*HW): images side by side on lanes
        if bt == 1:
            x_all = x_ref[0]
        else:
            x_all = jnp.concatenate([x_ref[b] for b in range(bt)], axis=1)

        # left path:  (k0,1) conv -> (1,k1) conv
        xl = stage(x_all, wsq_l1, a_sq_l1, wcv_l1, a_cv_l1, W, pad0, k0, None)
        xl = stage(xl, wsq_l2, a_sq_l2, wcv_l2, a_cv_l2, 1, pad1, k1, masks1)
        # stage x_l through o_ref (lane-dense store) to cut vreg pressure
        for b in range(bt):
            o_ref[b] = xl[:, b * HW:(b + 1) * HW].astype(o_ref.dtype)

        # right path: (1,k1) conv -> (k0,1) conv, accumulated into o_ref
        xr = stage(x_all, wsq_r1, a_sq_r1, wcv_r1, a_cv_r1, 1, pad1, k1, masks1)
        xr = stage(xr, wsq_r2, a_sq_r2, wcv_r2, a_cv_r2, W, pad0, k0, None)
        for b in range(bt):
            o_ref[b] = o_ref[b] + xr[:, b * HW:(b + 1) * HW].astype(o_ref.dtype)

    scratch_shapes = [
        pltpu.VMEM((Cs, spad_w), compute_dtype),       # padded shift scratch
        pltpu.VMEM((kmax * Cs, N), compute_dtype),     # im2col taps scratch
    ]
    return kernel, scratch_shapes


# ---------------------------- pallas_call wrapper --------------------------- #

def _pick_bt(B, HW, Cin, Cs, Cout, kmax):
    """Largest batch tile that divides B, keeps >=2 grid steps (two v7x
    TensorCores) and a modest per-step VMEM footprint (safe on v7x's 64 MiB)."""
    per_img = 4 * HW * (2 * Cin + 4 * Cout + kmax * Cs)   # rough bytes/image
    cap = max(1, (16 << 20) // max(per_img, 1))
    best = 1
    for d in range(1, B + 1):
        if B % d == 0 and d <= cap and (B // d >= 2 or B == 1):
            best = d
    return best


def gcm_forward(x_nchw, params, kernel_size, compute_dtype=jnp.float32):
    B, Cin, H, W = x_nchw.shape
    k0, k1 = kernel_size
    HW = H * W
    Cs = params["l1"]["w_sq"].shape[1]
    Cout = params["l1"]["w_cv"].shape[-1]
    kmax = max(k0, k1)

    bt = _pick_bt(B, HW, Cin, Cs, Cout, kmax)
    kernel, scratch_shapes = _make_gcm_kernel(H, W, Cin, Cs, Cout, k0, k1, bt,
                                              compute_dtype)

    # NCHW -> (B, C, HW): a FREE reshape (no HBM transpose on either side).
    x_flat = x_nchw.reshape(B, Cin, HW).astype(compute_dtype)

    def wspec(shape):
        n = len(shape)
        return pl.BlockSpec(shape, lambda g, _n=n: (0,) * _n)  # resident weights

    stage_in, stage_specs = [], []
    for name in ("l1", "l2", "r1", "r2"):
        p = params[name]
        K = p["w_cv"].shape[0]
        w_sq_t = jnp.transpose(p["w_sq"]).astype(compute_dtype)          # (Cs, Cin_s)
        w_cv_t = jnp.transpose(
            p["w_cv"].reshape(K * Cs, Cout)).astype(compute_dtype)       # (Cout, K*Cs)
        stage_in += [w_sq_t, p["a_sq"], w_cv_t, p["a_cv"]]
        stage_specs += [wspec(w_sq_t.shape), wspec(p["a_sq"].shape),
                        wspec(w_cv_t.shape), wspec(p["a_cv"].shape)]

    y_flat = pl.pallas_call(
        kernel,
        out_shape=jax.ShapeDtypeStruct((B, Cout, HW), jnp.float32),
        grid_spec=pltpu.PrefetchScalarGridSpec(
            num_scalar_prefetch=0,
            grid=(B // bt,),
            in_specs=[pl.BlockSpec((bt, Cin, HW), lambda g: (g, 0, 0))]
                     + stage_specs,
            out_specs=pl.BlockSpec((bt, Cout, HW), lambda g: (g, 0, 0)),
            scratch_shapes=scratch_shapes,
        ),
        compiler_params=pltpu.CompilerParams(
            dimension_semantics=("parallel",)),
    )(x_flat, *stage_in)

    return y_flat.reshape(B, Cout, H, W)


# ------------------------------- parameters -------------------------------- #

def _bn_fold(key, planes, conv_bias):
    """Fold conv bias + inference-mode BatchNorm into per-channel (scale, bias),
    stored as shape (C, 2) so it broadcasts along the lane (pixel) axis."""
    k1_, k2_, k3_, k4_ = jax.random.split(key, 4)
    gamma = 1.0 + 0.1 * jax.random.normal(k1_, (planes,), jnp.float32)
    beta = 0.1 * jax.random.normal(k2_, (planes,), jnp.float32)
    mean = 0.1 * jax.random.normal(k3_, (planes,), jnp.float32)
    var = jax.random.uniform(k4_, (planes,), jnp.float32, 0.5, 1.5)
    scale = gamma / jnp.sqrt(var + EPS)
    bias = beta + (conv_bias - mean) * scale
    return jnp.stack([scale, bias], axis=1)          # (C, 2)


def _init_stage(key, cin, cs, cout, ktaps):
    k = jax.random.split(key, 6)
    w_sq = 0.25 * jax.random.normal(k[0], (cin, cs), jnp.float32)
    b_sq = 0.05 * jax.random.normal(k[1], (cs,), jnp.float32)
    a_sq = _bn_fold(k[2], cs, b_sq)
    w_cv = 0.15 * jax.random.normal(k[3], (ktaps, cs, cout), jnp.float32)
    b_cv = 0.05 * jax.random.normal(k[4], (cout,), jnp.float32)
    a_cv = _bn_fold(k[5], cout, b_cv)
    return dict(w_sq=w_sq, a_sq=a_sq, w_cv=w_cv, a_cv=a_cv)


def init_gcm(key, in_dim, out_dim, kernel_size, squeeze_ratio=8):
    assert kernel_size[0] % 2 == 1 and kernel_size[1] % 2 == 1
    cs = out_dim // squeeze_ratio
    k0, k1 = kernel_size
    keys = jax.random.split(key, 4)
    return dict(
        l1=_init_stage(keys[0], in_dim, cs, out_dim, k0),   # (k0, 1) conv
        l2=_init_stage(keys[1], out_dim, cs, out_dim, k1),  # (1, k1) conv
        r1=_init_stage(keys[2], in_dim, cs, out_dim, k1),   # (1, k1) conv
        r2=_init_stage(keys[3], out_dim, cs, out_dim, k0),  # (k0, 1) conv
    )


# ---------------------------- pure-JAX reference ---------------------------- #

def _ref_stage(x_nhwc, p, kh, kw):
    s = jax.nn.relu(jnp.einsum("bhwc,cs->bhws", x_nhwc, p["w_sq"],
                               precision=lax.Precision.HIGHEST)
                    * p["a_sq"][:, 0] + p["a_sq"][:, 1])
    K, cs, cout = p["w_cv"].shape
    w_hwio = p["w_cv"].reshape(kh, kw, cs, cout)
    y = lax.conv_general_dilated(
        s, w_hwio, window_strides=(1, 1),
        padding=[((kh - 1) // 2,) * 2, ((kw - 1) // 2,) * 2],
        dimension_numbers=("NHWC", "HWIO", "NHWC"),
        precision=lax.Precision.HIGHEST)
    return jax.nn.relu(y * p["a_cv"][:, 0] + p["a_cv"][:, 1])


def gcm_reference(x_nchw, params, kernel_size):
    k0, k1 = kernel_size
    x = jnp.transpose(x_nchw, (0, 2, 3, 1))
    xl = _ref_stage(x, params["l1"], k0, 1)
    xl = _ref_stage(xl, params["l2"], 1, k1)
    xr = _ref_stage(x, params["r1"], 1, k1)
    xr = _ref_stage(xr, params["r2"], k0, 1)
    return jnp.transpose(xl + xr, (0, 3, 1, 2))


# ---------------------------------- main ------------------------------------ #

if __name__ == "__main__":
    key = jax.random.PRNGKey(0)
    k_x, k_p = jax.random.split(key)

    B, Cin, H, W = 2, 4, 16, 16
    out_dim = 32
    kernel_size = (7, 7)          # must be odd, per the module's assert

    x = jax.random.normal(k_x, (B, Cin, H, W), jnp.float32)
    params = init_gcm(k_p, Cin, out_dim, kernel_size)

    fwd = jax.jit(functools.partial(gcm_forward, params=params,
                                    kernel_size=kernel_size))
    y = jax.block_until_ready(fwd(x))
    assert y.shape == (B, out_dim, H, W)

    y_ref = gcm_reference(x, params, kernel_size)
    np.testing.assert_allclose(np.asarray(y), np.asarray(y_ref),
                               rtol=1e-2, atol=1e-2)

    print("KERNEL_OK")
</pallas_src>

<mosaic_0001>
module attributes {stable_mosaic.version = 11 : i64} {
  func.func @kernel(%arg0: i32, %arg1: memref<1x4x256xf32, #tpu.memory_space<vmem>>, %arg2: memref<4x4xf32, #tpu.memory_space<vmem>>, %arg3: memref<4x2xf32, #tpu.memory_space<vmem>>, %arg4: memref<32x28xf32, #tpu.memory_space<vmem>>, %arg5: memref<32x2xf32, #tpu.memory_space<vmem>>, %arg6: memref<4x32xf32, #tpu.memory_space<vmem>>, %arg7: memref<4x2xf32, #tpu.memory_space<vmem>>, %arg8: memref<32x28xf32, #tpu.memory_space<vmem>>, %arg9: memref<32x2xf32, #tpu.memory_space<vmem>>, %arg10: memref<4x4xf32, #tpu.memory_space<vmem>>, %arg11: memref<4x2xf32, #tpu.memory_space<vmem>>, %arg12: memref<32x28xf32, #tpu.memory_space<vmem>>, %arg13: memref<32x2xf32, #tpu.memory_space<vmem>>, %arg14: memref<4x32xf32, #tpu.memory_space<vmem>>, %arg15: memref<4x2xf32, #tpu.memory_space<vmem>>, %arg16: memref<32x28xf32, #tpu.memory_space<vmem>>, %arg17: memref<32x2xf32, #tpu.memory_space<vmem>>, %arg18: memref<1x32x256xf32, #tpu.memory_space<vmem>>, %arg19: memref<4x432xf32, #tpu.memory_space<vmem>>, %arg20: memref<28x256xf32, #tpu.memory_space<vmem>>) attributes {dimension_semantics = [#tpu.dimension_semantics<parallel>], iteration_bounds = array<i64: 2>, scalar_prefetch = 0 : i64, scratch_operands = 2 : i64, tpu.core_type = #tpu.core_type<tc>, window_params = [{transform_indices = @transform_0, window_bounds = array<i64: 1, 4, 256>}, {pipeline_mode = #tpu.pipeline_mode<synchronous>, transform_indices = @transform_1, window_bounds = array<i64: 4, 4>}, {pipeline_mode = #tpu.pipeline_mode<synchronous>, transform_indices = @transform_2, window_bounds = array<i64: 4, 2>}, {pipeline_mode = #tpu.pipeline_mode<synchronous>, transform_indices = @transform_3, window_bounds = array<i64: 32, 28>}, {pipeline_mode = #tpu.pipeline_mode<synchronous>, transform_indices = @transform_4, window_bounds = array<i64: 32, 2>}, {pipeline_mode = #tpu.pipeline_mode<synchronous>, transform_indices = @transform_5, window_bounds = array<i64: 4, 32>}, {pipeline_mode = #tpu.pipeline_mode<synchronous>, transform_indices = @transform_6, window_bounds = array<i64: 4, 2>}, {pipeline_mode = #tpu.pipeline_mode<synchronous>, transform_indices = @transform_7, window_bounds = array<i64: 32, 28>}, {pipeline_mode = #tpu.pipeline_mode<synchronous>, transform_indices = @transform_8, window_bounds = array<i64: 32, 2>}, {pipeline_mode = #tpu.pipeline_mode<synchronous>, transform_indices = @transform_9, window_bounds = array<i64: 4, 4>}, {pipeline_mode = #tpu.pipeline_mode<synchronous>, transform_indices = @transform_10, window_bounds = array<i64: 4, 2>}, {pipeline_mode = #tpu.pipeline_mode<synchronous>, transform_indices = @transform_11, window_bounds = array<i64: 32, 28>}, {pipeline_mode = #tpu.pipeline_mode<synchronous>, transform_indices = @transform_12, window_bounds = array<i64: 32, 2>}, {pipeline_mode = #tpu.pipeline_mode<synchronous>, transform_indices = @transform_13, window_bounds = array<i64: 4, 32>}, {pipeline_mode = #tpu.pipeline_mode<synchronous>, transform_indices = @transform_14, window_bounds = array<i64: 4, 2>}, {pipeline_mode = #tpu.pipeline_mode<synchronous>, transform_indices = @transform_15, window_bounds = array<i64: 32, 28>}, {pipeline_mode = #tpu.pipeline_mode<synchronous>, transform_indices = @transform_16, window_bounds = array<i64: 32, 2>}, {transform_indices = @transform_17, window_bounds = array<i64: 1, 32, 256>}]} {
    %cst = arith.constant 0.000000e+00 : f32
    %0 = vector.broadcast %cst : f32 to vector<4x128xf32>
    %c0 = arith.constant 0 : index
    %c0_0 = arith.constant 0 : index
    %1 = vector.load %arg19[%c0, %c0_0] : memref<4x432xf32, #tpu.memory_space<vmem>>, vector<4x128xf32>
    tpu.vector_store %arg19[%c0, %c0_0], %0 {strides = array<i32>} : memref<4x432xf32, #tpu.memory_space<vmem>>, vector<4x128xf32>,
    %cst_1 = arith.constant 0.000000e+00 : f32
    %2 = vector.broadcast %cst_1 : f32 to vector<4x48xf32>
    %c0_2 = arith.constant 0 : index
    %c384 = arith.constant 384 : index
    %3 = vector.load %arg19[%c0_2, %c384] : memref<4x432xf32, #tpu.memory_space<vmem>>, vector<4x48xf32>
    tpu.vector_store %arg19[%c0_2, %c384], %2 {strides = array<i32>} : memref<4x432xf32, #tpu.memory_space<vmem>>, vector<4x48xf32>,
    %4 = tpu.iota {dimensions = array<i32: 1>} : vector<1x256xi32>
    %c16_i32 = arith.constant 16 : i32
    %c0_i32 = arith.constant 0 : i32
    %5 = arith.cmpi eq, %c16_i32, %c0_i32 : i32
    %c1_i32 = arith.constant 1 : i32
    %6 = arith.select %5, %c1_i32, %c16_i32 : i32
    %7 = vector.broadcast %6 : i32 to vector<1x256xi32>
    %8 = arith.remsi %4, %7 : vector<1x256xi32>
    %c0_i32_3 = arith.constant 0 : i32
    %9 = vector.broadcast %c0_i32_3 : i32 to vector<1x256xi32>
    %10 = arith.cmpi ne, %8, %9 : vector<1x256xi32>
    %c0_i32_4 = arith.constant 0 : i32
    %11 = vector.broadcast %c0_i32_4 : i32 to vector<1x256xi32>
    %12 = arith.cmpi slt, %8, %11 : vector<1x256xi32>
    %c0_i32_5 = arith.constant 0 : i32
    %13 = arith.cmpi slt, %6, %c0_i32_5 : i32
    %14 = vector.broadcast %13 : i1 to vector<1x256xi1>
    %15 = vector.broadcast %14 : vector<1x256xi1> to vector<1x256xi1>
    %16 = arith.xori %12, %15 : vector<1x256xi1>
    %17 = arith.andi %16, %10 : vector<1x256xi1>
    %18 = vector.broadcast %6 : i32 to vector<1x256xi32>
    %19 = arith.addi %8, %18 : vector<1x256xi32>
    %20 = arith.select %17, %19, %8 : vector<1x256xi1>, vector<1x256xi32>
    %c-3_i32 = arith.constant -3 : i32
    %21 = vector.broadcast %c-3_i32 : i32 to vector<1x256xi32>
    %22 = arith.addi %20, %21 : vector<1x256xi32>
    %c0_i32_6 = arith.constant 0 : i32
    %23 = vector.broadcast %c0_i32_6 : i32 to vector<1x256xi32>
    %24 = arith.cmpi sge, %22, %23 : vector<1x256xi32>
    %c-3_i32_7 = arith.constant -3 : i32
    %25 = vector.broadcast %c-3_i32_7 : i32 to vector<1x256xi32>
    %26 = arith.addi %20, %25 : vector<1x256xi32>
    %c16_i32_8 = arith.constant 16 : i32
    %27 = vector.broadcast %c16_i32_8 : i32 to vector<1x256xi32>
    %28 = arith.cmpi slt, %26, %27 : vector<1x256xi32>
    %29 = arith.andi %24, %28 : vector<1x256xi1>
    %30 = arith.extui %29 : vector<1x256xi1> to vector<1x256xi32>
    %31 = arith.sitofp %30 : vector<1x256xi32> to vector<1x256xf32>
    %c-2_i32 = arith.constant -2 : i32
    %32 = vector.broadcast %c-2_i32 : i32 to vector<1x256xi32>
    %33 = arith.addi %20, %32 : vector<1x256xi32>
    %c0_i32_9 = arith.constant 0 : i32
    %34 = vector.broadcast %c0_i32_9 : i32 to vector<1x256xi32>
    %35 = arith.cmpi sge, %33, %34 : vector<1x256xi32>
    %c-2_i32_10 = arith.constant -2 : i32
    %36 = vector.broadcast %c-2_i32_10 : i32 to vector<1x256xi32>
    %37 = arith.addi %20, %36 : vector<1x256xi32>
    %c16_i32_11 = arith.constant 16 : i32
    %38 = vector.broadcast %c16_i32_11 : i32 to vector<1x256xi32>
    %39 = arith.cmpi slt, %37, %38 : vector<1x256xi32>
    %40 = arith.andi %35, %39 : vector<1x256xi1>
    %41 = arith.extui %40 : vector<1x256xi1> to vector<1x256xi32>
    %42 = arith.sitofp %41 : vector<1x256xi32> to vector<1x256xf32>
    %c-1_i32 = arith.constant -1 : i32
    %43 = vector.broadcast %c-1_i32 : i32 to vector<1x256xi32>
    %44 = arith.addi %20, %43 : vector<1x256xi32>
    %c0_i32_12 = arith.constant 0 : i32
    %45 = vector.broadcast %c0_i32_12 : i32 to vector<1x256xi32>
    %46 = arith.cmpi sge, %44, %45 : vector<1x256xi32>
    %c-1_i32_13 = arith.constant -1 : i32
    %47 = vector.broadcast %c-1_i32_13 : i32 to vector<1x256xi32>
    %48 = arith.addi %20, %47 : vector<1x256xi32>
    %c16_i32_14 = arith.constant 16 : i32
    %49 = vector.broadcast %c16_i32_14 : i32 to vector<1x256xi32>
    %50 = arith.cmpi slt, %48, %49 : vector<1x256xi32>
    %51 = arith.andi %46, %50 : vector<1x256xi1>
    %52 = arith.extui %51 : vector<1x256xi1> to vector<1x256xi32>
    %53 = arith.sitofp %52 : vector<1x256xi32> to vector<1x256xf32>
    %c0_i32_15 = arith.constant 0 : i32
    %54 = vector.broadcast %c0_i32_15 : i32 to vector<1x256xi32>
    %55 = arith.addi %20, %54 : vector<1x256xi32>
    %c0_i32_16 = arith.constant 0 : i32
    %56 = vector.broadcast %c0_i32_16 : i32 to vector<1x256xi32>
    %57 = arith.cmpi sge, %55, %56 : vector<1x256xi32>
    %c0_i32_17 = arith.constant 0 : i32
    %58 = vector.broadcast %c0_i32_17 : i32 to vector<1x256xi32>
    %59 = arith.addi %20, %58 : vector<1x256xi32>
    %c16_i32_18 = arith.constant 16 : i32
    %60 = vector.broadcast %c16_i32_18 : i32 to vector<1x256xi32>
    %61 = arith.cmpi slt, %59, %60 : vector<1x256xi32>
    %62 = arith.andi %57, %61 : vector<1x256xi1>
    %63 = arith.extui %62 : vector<1x256xi1> to vector<1x256xi32>
    %64 = arith.sitofp %63 : vector<1x256xi32> to vector<1x256xf32>
    %c1_i32_19 = arith.constant 1 : i32
    %65 = vector.broadcast %c1_i32_19 : i32 to vector<1x256xi32>
    %66 = arith.addi %20, %65 : vector<1x256xi32>
    %c0_i32_20 = arith.constant 0 : i32
    %67 = vector.broadcast %c0_i32_20 : i32 to vector<1x256xi32>
    %68 = arith.cmpi sge, %66, %67 : vector<1x256xi32>
    %c1_i32_21 = arith.constant 1 : i32
    %69 = vector.broadcast %c1_i32_21 : i32 to vector<1x256xi32>
    %70 = arith.addi %20, %69 : vector<1x256xi32>
    %c16_i32_22 = arith.constant 16 : i32
    %71 = vector.broadcast %c16_i32_22 : i32 to vector<1x256xi32>
    %72 = arith.cmpi slt, %70, %71 : vector<1x256xi32>
    %73 = arith.andi %68, %72 : vector<1x256xi1>
    %74 = arith.extui %73 : vector<1x256xi1> to vector<1x256xi32>
    %75 = arith.sitofp %74 : vector<1x256xi32> to vector<1x256xf32>
    %c2_i32 = arith.constant 2 : i32
    %76 = vector.broadcast %c2_i32 : i32 to vector<1x256xi32>
    %77 = arith.addi %20, %76 : vector<1x256xi32>
    %c0_i32_23 = arith.constant 0 : i32
    %78 = vector.broadcast %c0_i32_23 : i32 to vector<1x256xi32>
    %79 = arith.cmpi sge, %77, %78 : vector<1x256xi32>
    %c2_i32_24 = arith.constant 2 : i32
    %80 = vector.broadcast %c2_i32_24 : i32 to vector<1x256xi32>
    %81 = arith.addi %20, %80 : vector<1x256xi32>
    %c16_i32_25 = arith.constant 16 : i32
    %82 = vector.broadcast %c16_i32_25 : i32 to vector<1x256xi32>
    %83 = arith.cmpi slt, %81, %82 : vector<1x256xi32>
    %84 = arith.andi %79, %83 : vector<1x256xi1>
    %85 = arith.extui %84 : vector<1x256xi1> to vector<1x256xi32>
    %86 = arith.sitofp %85 : vector<1x256xi32> to vector<1x256xf32>
    %c3_i32 = arith.constant 3 : i32
    %87 = vector.broadcast %c3_i32 : i32 to vector<1x256xi32>
    %88 = arith.addi %20, %87 : vector<1x256xi32>
    %c0_i32_26 = arith.constant 0 : i32
    %89 = vector.broadcast %c0_i32_26 : i32 to vector<1x256xi32>
    %90 = arith.cmpi sge, %88, %89 : vector<1x256xi32>
    %c3_i32_27 = arith.constant 3 : i32
    %91 = vector.broadcast %c3_i32_27 : i32 to vector<1x256xi32>
    %92 = arith.addi %20, %91 : vector<1x256xi32>
    %c16_i32_28 = arith.constant 16 : i32
    %93 = vector.broadcast %c16_i32_28 : i32 to vector<1x256xi32>
    %94 = arith.cmpi slt, %92, %93 : vector<1x256xi32>
    %95 = arith.andi %90, %94 : vector<1x256xi1>
    %96 = arith.extui %95 : vector<1x256xi1> to vector<1x256xi32>
    %97 = arith.sitofp %96 : vector<1x256xi32> to vector<1x256xf32>
    %c0_29 = arith.constant 0 : index
    %c0_30 = arith.constant 0 : index
    %c0_31 = arith.constant 0 : index
    %98 = vector.load %arg1[%c0_29, %c0_30, %c0_31] : memref<1x4x256xf32, #tpu.memory_space<vmem>>, vector<1x4x256xf32>
    %99 = vector.shape_cast %98 : vector<1x4x256xf32> to vector<4x256xf32>
    %c0_32 = arith.constant 0 : index
    %c0_33 = arith.constant 0 : index
    %100 = vector.load %arg3[%c0_32, %c0_33] : memref<4x2xf32, #tpu.memory_space<vmem>>, vector<4x2xf32>
    %c0_34 = arith.constant 0 : index
    %c0_35 = arith.constant 0 : index
    %101 = vector.load %arg2[%c0_34, %c0_35] : memref<4x4xf32, #tpu.memory_space<vmem>>, vector<4x4xf32>
    %cst_36 = arith.constant dense<0.000000e+00> : vector<4x256xf32>
    %102 = tpu.matmul %101, %99, %cst_36 {dimension_numbers = #tpu.dot_dimension_numbers<[1], [0], [0], [1], [0, 0, 1, 1], [], []>} : vector<4x4xf32>, vector<4x256xf32>, vector<4x256xf32> -> vector<4x256xf32>
    %103 = vector.extract_strided_slice %100 {offsets = [0, 0], sizes = [4, 1], strides = [1, 1]} : vector<4x2xf32> to vector<4x1xf32>
    %104 = vector.broadcast %103 : vector<4x1xf32> to vector<4x256xf32>
    %105 = arith.mulf %102, %104 : vector<4x256xf32>
    %106 = vector.extract_strided_slice %100 {offsets = [0, 1], sizes = [4, 1], strides = [1, 1]} : vector<4x2xf32> to vector<4x1xf32>
    %107 = vector.broadcast %106 : vector<4x1xf32> to vector<4x256xf32>
    %108 = arith.addf %105, %107 : vector<4x256xf32>
    %cst_37 = arith.constant 0.000000e+00 : f32
    %109 = vector.broadcast %cst_37 : f32 to vector<4x256xf32>
    %110 = arith.maximumf %108, %109 : vector<4x256xf32>
    %c0_38 = arith.constant 0 : index
    %c128 = arith.constant 128 : index
    %111 = vector.load %arg19[%c0_38, %c128] : memref<4x432xf32, #tpu.memory_space<vmem>>, vector<4x256xf32>
    tpu.vector_store %arg19[%c0_38, %c128], %110 {strides = array<i32>} : memref<4x432xf32, #tpu.memory_space<vmem>>, vector<4x256xf32>,
    %c0_39 = arith.constant 0 : index
    %c80 = arith.constant 80 : index
    %112 = vector.load %arg19[%c0_39, %c80] : memref<4x432xf32, #tpu.memory_space<vmem>>, vector<4x256xf32>
    %c0_40 = arith.constant 0 : index
    %c0_41 = arith.constant 0 : index
    %113 = vector.load %arg20[%c0_40, %c0_41] : memref<28x256xf32, #tpu.memory_space<vmem>>, vector<4x256xf32>
    tpu.vector_store %arg20[%c0_40, %c0_41], %112 {strides = array<i32>} : memref<28x256xf32, #tpu.memory_space<vmem>>, vector<4x256xf32>,
    %c0_42 = arith.constant 0 : index
    %c96 = arith.constant 96 : index
    %114 = vector.load %arg19[%c0_42, %c96] : memref<4x432xf32, #tpu.memory_space<vmem>>, vector<4x256xf32>
    %c4 = arith.constant 4 : index
    %c0_43 = arith.constant 0 : index
    %115 = vector.load %arg20[%c4, %c0_43] : memref<28x256xf32, #tpu.memory_space<vmem>>, vector<4x256xf32>
    tpu.vector_store %arg20[%c4, %c0_43], %114 {strides = array<i32>} : memref<28x256xf32, #tpu.memory_space<vmem>>, vector<4x256xf32>,
    %c0_44 = arith.constant 0 : index
    %c112 = arith.constant 112 : index
    %116 = vector.load %arg19[%c0_44, %c112] : memref<4x432xf32, #tpu.memory_space<vmem>>, vector<4x256xf32>
    %c8 = arith.constant 8 : index
    %c0_45 = arith.constant 0 : index
    %117 = vector.load %arg20[%c8, %c0_45] : memref<28x256xf32, #tpu.memory_space<vmem>>, vector<4x256xf32>
    tpu.vector_store %arg20[%c8, %c0_45], %116 {strides = array<i32>} : memref<28x256xf32, #tpu.memory_space<vmem>>, vector<4x256xf32>,
    %c0_46 = arith.constant 0 : index
    %c128_47 = arith.constant 128 : index
    %118 = vector.load %arg19[%c0_46, %c128_47] : memref<4x432xf32, #tpu.memory_space<vmem>>, vector<4x256xf32>
    %c12 = arith.constant 12 : index
    %c0_48 = arith.constant 0 : index
    %119 = vector.load %arg20[%c12, %c0_48] : memref<28x256xf32, #tpu.memory_space<vmem>>, vector<4x256xf32>
    tpu.vector_store %arg20[%c12, %c0_48], %118 {strides = array<i32>} : memref<28x256xf32, #tpu.memory_space<vmem>>, vector<4x256xf32>,
    %c0_49 = arith.constant 0 : index
    %c144 = arith.constant 144 : index
    %120 = vector.load %arg19[%c0_49, %c144] : memref<4x432xf32, #tpu.memory_space<vmem>>, vector<4x256xf32>
    %c16 = arith.constant 16 : index
    %c0_50 = arith.constant 0 : index
    %121 = vector.load %arg20[%c16, %c0_50] : memref<28x256xf32, #tpu.memory_space<vmem>>, vector<4x256xf32>
    tpu.vector_store %arg20[%c16, %c0_50], %120 {strides = array<i32>} : memref<28x256xf32, #tpu.memory_space<vmem>>, vector<4x256xf32>,
    %c0_51 = arith.constant 0 : index
    %c160 = arith.constant 160 : index
    %122 = vector.load %arg19[%c0_51, %c160] : memref<4x432xf32, #tpu.memory_space<vmem>>, vector<4x256xf32>
    %c20 = arith.constant 20 : index
    %c0_52 = arith.constant 0 : index
    %123 = vector.load %arg20[%c20, %c0_52] : memref<28x256xf32, #tpu.memory_space<vmem>>, vector<4x256xf32>
    tpu.vector_store %arg20[%c20, %c0_52], %122 {strides = array<i32>} : memref<28x256xf32, #tpu.memory_space<vmem>>, vector<4x256xf32>,
    %c0_53 = arith.constant 0 : index
    %c176 = arith.constant 176 : index
    %124 = vector.load %arg19[%c0_53, %c176] : memref<4x432xf32, #tpu.memory_space<vmem>>, vector<4x256xf32>
    %c24 = arith.constant 24 : index
    %c0_54 = arith.constant 0 : index
    %125 = vector.load %arg20[%c24, %c0_54] : memref<28x256xf32, #tpu.memory_space<vmem>>, vector<4x256xf32>
    tpu.vector_store %arg20[%c24, %c0_54], %124 {strides = array<i32>} : memref<28x256xf32, #tpu.memory_space<vmem>>, vector<4x256xf32>,
    %c0_55 = arith.constant 0 : index
    %c0_56 = arith.constant 0 : index
    %126 = vector.load %arg5[%c0_55, %c0_56] : memref<32x2xf32, #tpu.memory_space<vmem>>, vector<32x2xf32>
    %c0_57 = arith.constant 0 : index
    %c0_58 = arith.constant 0 : index
    %127 = vector.load %arg4[%c0_57, %c0_58] : memref<32x28xf32, #tpu.memory_space<vmem>>, vector<32x28xf32>
    %c0_59 = arith.constant 0 : index
    %c0_60 = arith.constant 0 : index
    %128 = vector.load %arg20[%c0_59, %c0_60] : memref<28x256xf32, #tpu.memory_space<vmem>>, vector<28x256xf32>
    %cst_61 = arith.constant dense<0.000000e+00> : vector<32x256xf32>
    %129 = tpu.matmul %127, %128, %cst_61 {dimension_numbers = #tpu.dot_dimension_numbers<[1], [0], [0], [1], [0, 0, 1, 1], [], []>} : vector<32x28xf32>, vector<28x256xf32>, vector<32x256xf32> -> vector<32x256xf32>
    %130 = vector.extract_strided_slice %126 {offsets = [0, 0], sizes = [32, 1], strides = [1, 1]} : vector<32x2xf32> to vector<32x1xf32>
    %131 = vector.broadcast %130 : vector<32x1xf32> to vector<32x256xf32>
    %132 = arith.mulf %129, %131 : vector<32x256xf32>
    %133 = vector.extract_strided_slice %126 {offsets = [0, 1], sizes = [32, 1], strides = [1, 1]} : vector<32x2xf32> to vector<32x1xf32>
    %134 = vector.broadcast %133 : vector<32x1xf32> to vector<32x256xf32>
    %135 = arith.addf %132, %134 : vector<32x256xf32>
    %cst_62 = arith.constant 0.000000e+00 : f32
    %136 = vector.broadcast %cst_62 : f32 to vector<32x256xf32>
    %137 = arith.maximumf %135, %136 : vector<32x256xf32>
    %c0_63 = arith.constant 0 : index
    %c0_64 = arith.constant 0 : index
    %138 = vector.load %arg7[%c0_63, %c0_64] : memref<4x2xf32, #tpu.memory_space<vmem>>, vector<4x2xf32>
    %c0_65 = arith.constant 0 : index
    %c0_66 = arith.constant 0 : index
    %139 = vector.load %arg6[%c0_65, %c0_66] : memref<4x32xf32, #tpu.memory_space<vmem>>, vector<4x32xf32>
    %cst_67 = arith.constant dense<0.000000e+00> : vector<4x256xf32>
    %140 = tpu.matmul %139, %137, %cst_67 {dimension_numbers = #tpu.dot_dimension_numbers<[1], [0], [0], [1], [0, 0, 1, 1], [], []>} : vector<4x32xf32>, vector<32x256xf32>, vector<4x256xf32> -> vector<4x256xf32>
    %141 = vector.extract_strided_slice %138 {offsets = [0, 0], sizes = [4, 1], strides = [1, 1]} : vector<4x2xf32> to vector<4x1xf32>
    %142 = vector.broadcast %141 : vector<4x1xf32> to vector<4x256xf32>
    %143 = arith.mulf %140, %142 : vector<4x256xf32>
    %144 = vector.extract_strided_slice %138 {offsets = [0, 1], sizes = [4, 1], strides = [1, 1]} : vector<4x2xf32> to vector<4x1xf32>
    %145 = vector.broadcast %144 : vector<4x1xf32> to vector<4x256xf32>
    %146 = arith.addf %143, %145 : vector<4x256xf32>
    %cst_68 = arith.constant 0.000000e+00 : f32
    %147 = vector.broadcast %cst_68 : f32 to vector<4x256xf32>
    %148 = arith.maximumf %146, %147 : vector<4x256xf32>
    %c0_69 = arith.constant 0 : index
    %c128_70 = arith.constant 128 : index
    %149 = vector.load %arg19[%c0_69, %c128_70] : memref<4x432xf32, #tpu.memory_space<vmem>>, vector<4x256xf32>
    tpu.vector_store %arg19[%c0_69, %c128_70], %148 {strides = array<i32>} : memref<4x432xf32, #tpu.memory_space<vmem>>, vector<4x256xf32>,
    %c0_71 = arith.constant 0 : index
    %c125 = arith.constant 125 : index
    %150 = vector.load %arg19[%c0_71, %c125] : memref<4x432xf32, #tpu.memory_space<vmem>>, vector<4x256xf32>
    %151 = vector.broadcast %31 : vector<1x256xf32> to vector<4x256xf32>
    %152 = arith.mulf %150, %151 : vector<4x256xf32>
    %c0_72 = arith.constant 0 : index
    %c0_73 = arith.constant 0 : index
    %153 = vector.load %arg20[%c0_72, %c0_73] : memref<28x256xf32, #tpu.memory_space<vmem>>, vector<4x256xf32>
    tpu.vector_store %arg20[%c0_72, %c0_73], %152 {strides = array<i32>} : memref<28x256xf32, #tpu.memory_space<vmem>>, vector<4x256xf32>,
    %c0_74 = arith.constant 0 : index
    %c126 = arith.constant 126 : index
    %154 = vector.load %arg19[%c0_74, %c126] : memref<4x432xf32, #tpu.memory_space<vmem>>, vector<4x256xf32>
    %155 = vector.broadcast %42 : vector<1x256xf32> to vector<4x256xf32>
    %156 = arith.mulf %154, %155 : vector<4x256xf32>
    %c4_75 = arith.constant 4 : index
    %c0_76 = arith.constant 0 : index
    %157 = vector.load %arg20[%c4_75, %c0_76] : memref<28x256xf32, #tpu.memory_space<vmem>>, vector<4x256xf32>
    tpu.vector_store %arg20[%c4_75, %c0_76], %156 {strides = array<i32>} : memref<28x256xf32, #tpu.memory_space<vmem>>, vector<4x256xf32>,
    %c0_77 = arith.constant 0 : index
    %c127 = arith.constant 127 : index
    %158 = vector.load %arg19[%c0_77, %c127] : memref<4x432xf32, #tpu.memory_space<vmem>>, vector<4x256xf32>
    %159 = vector.broadcast %53 : vector<1x256xf32> to vector<4x256xf32>
    %160 = arith.mulf %158, %159 : vector<4x256xf32>
    %c8_78 = arith.constant 8 : index
    %c0_79 = arith.constant 0 : index
    %161 = vector.load %arg20[%c8_78, %c0_79] : memref<28x256xf32, #tpu.memory_space<vmem>>, vector<4x256xf32>
    tpu.vector_store %arg20[%c8_78, %c0_79], %160 {strides = array<i32>} : memref<28x256xf32, #tpu.memory_space<vmem>>, vector<4x256xf32>,
    %c0_80 = arith.constant 0 : index
    %c128_81 = arith.constant 128 : index
    %162 = vector.load %arg19[%c0_80, %c128_81] : memref<4x432xf32, #tpu.memory_space<vmem>>, vector<4x256xf32>
    %163 = vector.broadcast %64 : vector<1x256xf32> to vector<4x256xf32>
    %164 = arith.mulf %162, %163 : vector<4x256xf32>
    %c12_82 = arith.constant 12 : index
    %c0_83 = arith.constant 0 : index
    %165 = vector.load %arg20[%c12_82, %c0_83] : memref<28x256xf32, #tpu.memory_space<vmem>>, vector<4x256xf32>
    tpu.vector_store %arg20[%c12_82, %c0_83], %164 {strides = array<i32>} : memref<28x256xf32, #tpu.memory_space<vmem>>, vector<4x256xf32>,
    %c0_84 = arith.constant 0 : index
    %c129 = arith.constant 129 : index
    %166 = vector.load %arg19[%c0_84, %c129] : memref<4x432xf32, #tpu.memory_space<vmem>>, vector<4x256xf32>
    %167 = vector.broadcast %75 : vector<1x256xf32> to vector<4x256xf32>
    %168 = arith.mulf %166, %167 : vector<4x256xf32>
    %c16_85 = arith.constant 16 : index
    %c0_86 = arith.constant 0 : index
    %169 = vector.load %arg20[%c16_85, %c0_86] : memref<28x256xf32, #tpu.memory_space<vmem>>, vector<4x256xf32>
    tpu.vector_store %arg20[%c16_85, %c0_86], %168 {strides = array<i32>} : memref<28x256xf32, #tpu.memory_space<vmem>>, vector<4x256xf32>,
    %c0_87 = arith.constant 0 : index
    %c130 = arith.constant 130 : index
    %170 = vector.load %arg19[%c0_87, %c130] : memref<4x432xf32, #tpu.memory_space<vmem>>, vector<4x256xf32>
    %171 = vector.broadcast %86 : vector<1x256xf32> to vector<4x256xf32>
    %172 = arith.mulf %170, %171 : vector<4x256xf32>
    %c20_88 = arith.constant 20 : index
    %c0_89 = arith.constant 0 : index
    %173 = vector.load %arg20[%c20_88, %c0_89] : memref<28x256xf32, #tpu.memory_space<vmem>>, vector<4x256xf32>
    tpu.vector_store %arg20[%c20_88, %c0_89], %172 {strides = array<i32>} : memref<28x256xf32, #tpu.memory_space<vmem>>, vector<4x256xf32>,
    %c0_90 = arith.constant 0 : index
    %c131 = arith.constant 131 : index
    %174 = vector.load %arg19[%c0_90, %c131] : memref<4x432xf32, #tpu.memory_space<vmem>>, vector<4x256xf32>
    %175 = vector.broadcast %97 : vector<1x256xf32> to vector<4x256xf32>
    %176 = arith.mulf %174, %175 : vector<4x256xf32>
    %c24_91 = arith.constant 24 : index
    %c0_92 = arith.constant 0 : index
    %177 = vector.load %arg20[%c24_91, %c0_92] : memref<28x256xf32, #tpu.memory_space<vmem>>, vector<4x256xf32>
    tpu.vector_store %arg20[%c24_91, %c0_92], %176 {strides = array<i32>} : memref<28x256xf32, #tpu.memory_space<vmem>>, vector<4x256xf32>,
    %c0_93 = arith.constant 0 : index
    %c0_94 = arith.constant 0 : index
    %178 = vector.load %arg9[%c0_93, %c0_94] : memref<32x2xf32, #tpu.memory_space<vmem>>, vector<32x2xf32>
    %c0_95 = arith.constant 0 : index
    %c0_96 = arith.constant 0 : index
    %179 = vector.load %arg8[%c0_95, %c0_96] : memref<32x28xf32, #tpu.memory_space<vmem>>, vector<32x28xf32>
    %c0_97 = arith.constant 0 : index
    %c0_98 = arith.constant 0 : index
    %180 = vector.load %arg20[%c0_97, %c0_98] : memref<28x256xf32, #tpu.memory_space<vmem>>, vector<28x256xf32>
    %cst_99 = arith.constant dense<0.000000e+00> : vector<32x256xf32>
    %181 = tpu.matmul %179, %180, %cst_99 {dimension_numbers = #tpu.dot_dimension_numbers<[1], [0], [0], [1], [0, 0, 1, 1], [], []>} : vector<32x28xf32>, vector<28x256xf32>, vector<32x256xf32> -> vector<32x256xf32>
    %182 = vector.extract_strided_slice %178 {offsets = [0, 0], sizes = [32, 1], strides = [1, 1]} : vector<32x2xf32> to vector<32x1xf32>
    %183 = vector.broadcast %182 : vector<32x1xf32> to vector<32x256xf32>
    %184 = arith.mulf %181, %183 : vector<32x256xf32>
    %185 = vector.extract_strided_slice %178 {offsets = [0, 1], sizes = [32, 1], strides = [1, 1]} : vector<32x2xf32> to vector<32x1xf32>
    %186 = vector.broadcast %185 : vector<32x1xf32> to vector<32x256xf32>
    %187 = arith.addf %184, %186 : vector<32x256xf32>
    %cst_100 = arith.constant 0.000000e+00 : f32
    %188 = vector.broadcast %cst_100 : f32 to vector<32x256xf32>
    %189 = arith.maximumf %187, %188 : vector<32x256xf32>
    %c0_101 = arith.constant 0 : index
    %c0_102 = arith.constant 0 : index
    %c0_103 = arith.constant 0 : index
    %190 = vector.load %arg18[%c0_101, %c0_102, %c0_103] : memref<1x32x256xf32, #tpu.memory_space<vmem>>, vector<1x32x256xf32>
    %191 = vector.shape_cast %190 : vector<1x32x256xf32> to vector<32x256xf32>
    %192 = vector.shape_cast %189 : vector<32x256xf32> to vector<1x32x256xf32>
    tpu.vector_store %arg18[%c0_101, %c0_102, %c0_103], %192 {strides = array<i32>} : memref<1x32x256xf32, #tpu.memory_space<vmem>>, vector<1x32x256xf32>,
    %c0_104 = arith.constant 0 : index
    %c0_105 = arith.constant 0 : index
    %193 = vector.load %arg11[%c0_104, %c0_105] : memref<4x2xf32, #tpu.memory_space<vmem>>, vector<4x2xf32>
    %c0_106 = arith.constant 0 : index
    %c0_107 = arith.constant 0 : index
    %194 = vector.load %arg10[%c0_106, %c0_107] : memref<4x4xf32, #tpu.memory_space<vmem>>, vector<4x4xf32>
    %cst_108 = arith.constant dense<0.000000e+00> : vector<4x256xf32>
    %195 = tpu.matmul %194, %99, %cst_108 {dimension_numbers = #tpu.dot_dimension_numbers<[1], [0], [0], [1], [0, 0, 1, 1], [], []>} : vector<4x4xf32>, vector<4x256xf32>, vector<4x256xf32> -> vector<4x256xf32>
    %196 = vector.extract_strided_slice %193 {offsets = [0, 0], sizes = [4, 1], strides = [1, 1]} : vector<4x2xf32> to vector<4x1xf32>
    %197 = vector.broadcast %196 : vector<4x1xf32> to vector<4x256xf32>
    %198 = arith.mulf %195, %197 : vector<4x256xf32>
    %199 = vector.extract_strided_slice %193 {offsets = [0, 1], sizes = [4, 1], strides = [1, 1]} : vector<4x2xf32> to vector<4x1xf32>
    %200 = vector.broadcast %199 : vector<4x1xf32> to vector<4x256xf32>
    %201 = arith.addf %198, %200 : vector<4x256xf32>
    %cst_109 = arith.constant 0.000000e+00 : f32
    %202 = vector.broadcast %cst_109 : f32 to vector<4x256xf32>
    %203 = arith.maximumf %201, %202 : vector<4x256xf32>
    %c0_110 = arith.constant 0 : index
    %c128_111 = arith.constant 128 : index
    %204 = vector.load %arg19[%c0_110, %c128_111] : memref<4x432xf32, #tpu.memory_space<vmem>>, vector<4x256xf32>
    tpu.vector_store %arg19[%c0_110, %c128_111], %203 {strides = array<i32>} : memref<4x432xf32, #tpu.memory_space<vmem>>, vector<4x256xf32>,
    %c0_112 = arith.constant 0 : index
    %c125_113 = arith.constant 125 : index
    %205 = vector.load %arg19[%c0_112, %c125_113] : memref<4x432xf32, #tpu.memory_space<vmem>>, vector<4x256xf32>
    %206 = vector.broadcast %31 : vector<1x256xf32> to vector<4x256xf32>
    %207 = arith.mulf %205, %206 : vector<4x256xf32>
    %c0_114 = arith.constant 0 : index
    %c0_115 = arith.constant 0 : index
    %208 = vector.load %arg20[%c0_114, %c0_115] : memref<28x256xf32, #tpu.memory_space<vmem>>, vector<4x256xf32>
    tpu.vector_store %arg20[%c0_114, %c0_115], %207 {strides = array<i32>} : memref<28x256xf32, #tpu.memory_space<vmem>>, vector<4x256xf32>,
    %c0_116 = arith.constant 0 : index
    %c126_117 = arith.constant 126 : index
    %209 = vector.load %arg19[%c0_116, %c126_117] : memref<4x432xf32, #tpu.memory_space<vmem>>, vector<4x256xf32>
    %210 = vector.broadcast %42 : vector<1x256xf32> to vector<4x256xf32>
    %211 = arith.mulf %209, %210 : vector<4x256xf32>
    %c4_118 = arith.constant 4 : index
    %c0_119 = arith.constant 0 : index
    %212 = vector.load %arg20[%c4_118, %c0_119] : memref<28x256xf32, #tpu.memory_space<vmem>>, vector<4x256xf32>
    tpu.vector_store %arg20[%c4_118, %c0_119], %211 {strides = array<i32>} : memref<28x256xf32, #tpu.memory_space<vmem>>, vector<4x256xf32>,
    %c0_120 = arith.constant 0 : index
    %c127_121 = arith.constant 127 : index
    %213 = vector.load %arg19[%c0_120, %c127_121] : memref<4x432xf32, #tpu.memory_space<vmem>>, vector<4x256xf32>
    %214 = vector.broadcast %53 : vector<1x256xf32> to vector<4x256xf32>
    %215 = arith.mulf %213, %214 : vector<4x256xf32>
    %c8_122 = arith.constant 8 : index
    %c0_123 = arith.constant 0 : index
    %216 = vector.load %arg20[%c8_122, %c0_123] : memref<28x256xf32, #tpu.memory_space<vmem>>, vector<4x256xf32>
    tpu.vector_store %arg20[%c8_122, %c0_123], %215 {strides = array<i32>} : memref<28x256xf32, #tpu.memory_space<vmem>>, vector<4x256xf32>,
    %c0_124 = arith.constant 0 : index
    %c128_125 = arith.constant 128 : index
    %217 = vector.load %arg19[%c0_124, %c128_125] : memref<4x432xf32, #tpu.memory_space<vmem>>, vector<4x256xf32>
    %218 = vector.broadcast %64 : vector<1x256xf32> to vector<4x256xf32>
    %219 = arith.mulf %217, %218 : vector<4x256xf32>
    %c12_126 = arith.constant 12 : index
    %c0_127 = arith.constant 0 : index
    %220 = vector.load %arg20[%c12_126, %c0_127] : memref<28x256xf32, #tpu.memory_space<vmem>>, vector<4x256xf32>
    tpu.vector_store %arg20[%c12_126, %c0_127], %219 {strides = array<i32>} : memref<28x256xf32, #tpu.memory_space<vmem>>, vector<4x256xf32>,
    %c0_128 = arith.constant 0 : index
    %c129_129 = arith.constant 129 : index
    %221 = vector.load %arg19[%c0_128, %c129_129] : memref<4x432xf32, #tpu.memory_space<vmem>>, vector<4x256xf32>
    %222 = vector.broadcast %75 : vector<1x256xf32> to vector<4x256xf32>
    %223 = arith.mulf %221, %222 : vector<4x256xf32>
    %c16_130 = arith.constant 16 : index
    %c0_131 = arith.constant 0 : index
    %224 = vector.load %arg20[%c16_130, %c0_131] : memref<28x256xf32, #tpu.memory_space<vmem>>, vector<4x256xf32>
    tpu.vector_store %arg20[%c16_130, %c0_131], %223 {strides = array<i32>} : memref<28x256xf32, #tpu.memory_space<vmem>>, vector<4x256xf32>,
    %c0_132 = arith.constant 0 : index
    %c130_133 = arith.constant 130 : index
    %225 = vector.load %arg19[%c0_132, %c130_133] : memref<4x432xf32, #tpu.memory_space<vmem>>, vector<4x256xf32>
    %226 = vector.broadcast %86 : vector<1x256xf32> to vector<4x256xf32>
    %227 = arith.mulf %225, %226 : vector<4x256xf32>
    %c20_134 = arith.constant 20 : index
    %c0_135 = arith.constant 0 : index
    %228 = vector.load %arg20[%c20_134, %c0_135] : memref<28x256xf32, #tpu.memory_space<vmem>>, vector<4x256xf32>
    tpu.vector_store %arg20[%c20_134, %c0_135], %227 {strides = array<i32>} : memref<28x256xf32, #tpu.memory_space<vmem>>, vector<4x256xf32>,
    %c0_136 = arith.constant 0 : index
    %c131_137 = arith.constant 131 : index
    %229 = vector.load %arg19[%c0_136, %c131_137] : memref<4x432xf32, #tpu.memory_space<vmem>>, vector<4x256xf32>
    %230 = vector.broadcast %97 : vector<1x256xf32> to vector<4x256xf32>
    %231 = arith.mulf %229, %230 : vector<4x256xf32>
    %c24_138 = arith.constant 24 : index
    %c0_139 = arith.constant 0 : index
    %232 = vector.load %arg20[%c24_138, %c0_139] : memref<28x256xf32, #tpu.memory_space<vmem>>, vector<4x256xf32>
    tpu.vector_store %arg20[%c24_138, %c0_139], %231 {strides = array<i32>} : memref<28x256xf32, #tpu.memory_space<vmem>>, vector<4x256xf32>,
    %c0_140 = arith.constant 0 : index
    %c0_141 = arith.constant 0 : index
    %233 = vector.load %arg13[%c0_140, %c0_141] : memref<32x2xf32, #tpu.memory_space<vmem>>, vector<32x2xf32>
    %c0_142 = arith.constant 0 : index
    %c0_143 = arith.constant 0 : index
    %234 = vector.load %arg12[%c0_142, %c0_143] : memref<32x28xf32, #tpu.memory_space<vmem>>, vector<32x28xf32>
    %c0_144 = arith.constant 0 : index
    %c0_145 = arith.constant 0 : index
    %235 = vector.load %arg20[%c0_144, %c0_145] : memref<28x256xf32, #tpu.memory_space<vmem>>, vector<28x256xf32>
    %cst_146 = arith.constant dense<0.000000e+00> : vector<32x256xf32>
    %236 = tpu.matmul %234, %235, %cst_146 {dimension_numbers = #tpu.dot_dimension_numbers<[1], [0], [0], [1], [0, 0, 1, 1], [], []>} : vector<32x28xf32>, vector<28x256xf32>, vector<32x256xf32> -> vector<32x256xf32>
    %237 = vector.extract_strided_slice %233 {offsets = [0, 0], sizes = [32, 1], strides = [1, 1]} : vector<32x2xf32> to vector<32x1xf32>
    %238 = vector.broadcast %237 : vector<32x1xf32> to vector<32x256xf32>
    %239 = arith.mulf %236, %238 : vector<32x256xf32>
    %240 = vector.extract_strided_slice %233 {offsets = [0, 1], sizes = [32, 1], strides = [1, 1]} : vector<32x2xf32> to vector<32x1xf32>
    %241 = vector.broadcast %240 : vector<32x1xf32> to vector<32x256xf32>
    %242 = arith.addf %239, %241 : vector<32x256xf32>
    %cst_147 = arith.constant 0.000000e+00 : f32
    %243 = vector.broadcast %cst_147 : f32 to vector<32x256xf32>
    %244 = arith.maximumf %242, %243 : vector<32x256xf32>
    %c0_148 = arith.constant 0 : index
    %c0_149 = arith.constant 0 : index
    %245 = vector.load %arg15[%c0_148, %c0_149] : memref<4x2xf32, #tpu.memory_space<vmem>>, vector<4x2xf32>
    %c0_150 = arith.constant 0 : index
    %c0_151 = arith.constant 0 : index
    %246 = vector.load %arg14[%c0_150, %c0_151] : memref<4x32xf32, #tpu.memory_space<vmem>>, vector<4x32xf32>
    %cst_152 = arith.constant dense<0.000000e+00> : vector<4x256xf32>
    %247 = tpu.matmul %246, %244, %cst_152 {dimension_numbers = #tpu.dot_dimension_numbers<[1], [0], [0], [1], [0, 0, 1, 1], [], []>} : vector<4x32xf32>, vector<32x256xf32>, vector<4x256xf32> -> vector<4x256xf32>
    %248 = vector.extract_strided_slice %245 {offsets = [0, 0], sizes = [4, 1], strides = [1, 1]} : vector<4x2xf32> to vector<4x1xf32>
    %249 = vector.broadcast %248 : vector<4x1xf32> to vector<4x256xf32>
    %250 = arith.mulf %247, %249 : vector<4x256xf32>
    %251 = vector.extract_strided_slice %245 {offsets = [0, 1], sizes = [4, 1], strides = [1, 1]} : vector<4x2xf32> to vector<4x1xf32>
    %252 = vector.broadcast %251 : vector<4x1xf32> to vector<4x256xf32>
    %253 = arith.addf %250, %252 : vector<4x256xf32>
    %cst_153 = arith.constant 0.000000e+00 : f32
    %254 = vector.broadcast %cst_153 : f32 to vector<4x256xf32>
    %255 = arith.maximumf %253, %254 : vector<4x256xf32>
    %c0_154 = arith.constant 0 : index
    %c128_155 = arith.constant 128 : index
    %256 = vector.load %arg19[%c0_154, %c128_155] : memref<4x432xf32, #tpu.memory_space<vmem>>, vector<4x256xf32>
    tpu.vector_store %arg19[%c0_154, %c128_155], %255 {strides = array<i32>} : memref<4x432xf32, #tpu.memory_space<vmem>>, vector<4x256xf32>,
    %c0_156 = arith.constant 0 : index
    %c80_157 = arith.constant 80 : index
    %257 = vector.load %arg19[%c0_156, %c80_157] : memref<4x432xf32, #tpu.memory_space<vmem>>, vector<4x256xf32>
    %c0_158 = arith.constant 0 : index
    %c0_159 = arith.constant 0 : index
    %258 = vector.load %arg20[%c0_158, %c0_159] : memref<28x256xf32, #tpu.memory_space<vmem>>, vector<4x256xf32>
    tpu.vector_store %arg20[%c0_158, %c0_159], %257 {strides = array<i32>} : memref<28x256xf32, #tpu.memory_space<vmem>>, vector<4x256xf32>,
    %c0_160 = arith.constant 0 : index
    %c96_161 = arith.constant 96 : index
    %259 = vector.load %arg19[%c0_160, %c96_161] : memref<4x432xf32, #tpu.memory_space<vmem>>, vector<4x256xf32>
    %c4_162 = arith.constant 4 : index
    %c0_163 = arith.constant 0 : index
    %260 = vector.load %arg20[%c4_162, %c0_163] : memref<28x256xf32, #tpu.memory_space<vmem>>, vector<4x256xf32>
    tpu.vector_store %arg20[%c4_162, %c0_163], %259 {strides = array<i32>} : memref<28x256xf32, #tpu.memory_space<vmem>>, vector<4x256xf32>,
    %c0_164 = arith.constant 0 : index
    %c112_165 = arith.constant 112 : index
    %261 = vector.load %arg19[%c0_164, %c112_165] : memref<4x432xf32, #tpu.memory_space<vmem>>, vector<4x256xf32>
    %c8_166 = arith.constant 8 : index
    %c0_167 = arith.constant 0 : index
    %262 = vector.load %arg20[%c8_166, %c0_167] : memref<28x256xf32, #tpu.memory_space<vmem>>, vector<4x256xf32>
    tpu.vector_store %arg20[%c8_166, %c0_167], %261 {strides = array<i32>} : memref<28x256xf32, #tpu.memory_space<vmem>>, vector<4x256xf32>,
    %c0_168 = arith.constant 0 : index
    %c128_169 = arith.constant 128 : index
    %263 = vector.load %arg19[%c0_168, %c128_169] : memref<4x432xf32, #tpu.memory_space<vmem>>, vector<4x256xf32>
    %c12_170 = arith.constant 12 : index
    %c0_171 = arith.constant 0 : index
    %264 = vector.load %arg20[%c12_170, %c0_171] : memref<28x256xf32, #tpu.memory_space<vmem>>, vector<4x256xf32>
    tpu.vector_store %arg20[%c12_170, %c0_171], %263 {strides = array<i32>} : memref<28x256xf32, #tpu.memory_space<vmem>>, vector<4x256xf32>,
    %c0_172 = arith.constant 0 : index
    %c144_173 = arith.constant 144 : index
    %265 = vector.load %arg19[%c0_172, %c144_173] : memref<4x432xf32, #tpu.memory_space<vmem>>, vector<4x256xf32>
    %c16_174 = arith.constant 16 : index
    %c0_175 = arith.constant 0 : index
    %266 = vector.load %arg20[%c16_174, %c0_175] : memref<28x256xf32, #tpu.memory_space<vmem>>, vector<4x256xf32>
    tpu.vector_store %arg20[%c16_174, %c0_175], %265 {strides = array<i32>} : memref<28x256xf32, #tpu.memory_space<vmem>>, vector<4x256xf32>,
    %c0_176 = arith.constant 0 : index
    %c160_177 = arith.constant 160 : index
    %267 = vector.load %arg19[%c0_176, %c160_177] : memref<4x432xf32, #tpu.memory_space<vmem>>, vector<4x256xf32>
    %c20_178 = arith.constant 20 : index
    %c0_179 = arith.constant 0 : index
    %268 = vector.load %arg20[%c20_178, %c0_179] : memref<28x256xf32, #tpu.memory_space<vmem>>, vector<4x256xf32>
    tpu.vector_store %arg20[%c20_178, %c0_179], %267 {strides = array<i32>} : memref<28x256xf32, #tpu.memory_space<vmem>>, vector<4x256xf32>,
    %c0_180 = arith.constant 0 : index
    %c176_181 = arith.constant 176 : index
    %269 = vector.load %arg19[%c0_180, %c176_181] : memref<4x432xf32, #tpu.memory_space<vmem>>, vector<4x256xf32>
    %c24_182 = arith.constant 24 : index
    %c0_183 = arith.constant 0 : index
    %270 = vector.load %arg20[%c24_182, %c0_183] : memref<28x256xf32, #tpu.memory_space<vmem>>, vector<4x256xf32>
    tpu.vector_store %arg20[%c24_182, %c0_183], %269 {strides = array<i32>} : memref<28x256xf32, #tpu.memory_space<vmem>>, vector<4x256xf32>,
    %c0_184 = arith.constant 0 : index
    %c0_185 = arith.constant 0 : index
    %271 = vector.load %arg17[%c0_184, %c0_185] : memref<32x2xf32, #tpu.memory_space<vmem>>, vector<32x2xf32>
    %c0_186 = arith.constant 0 : index
    %c0_187 = arith.constant 0 : index
    %272 = vector.load %arg16[%c0_186, %c0_187] : memref<32x28xf32, #tpu.memory_space<vmem>>, vector<32x28xf32>
    %c0_188 = arith.constant 0 : index
    %c0_189 = arith.constant 0 : index
    %273 = vector.load %arg20[%c0_188, %c0_189] : memref<28x256xf32, #tpu.memory_space<vmem>>, vector<28x256xf32>
    %cst_190 = arith.constant dense<0.000000e+00> : vector<32x256xf32>
    %274 = tpu.matmul %272, %273, %cst_190 {dimension_numbers = #tpu.dot_dimension_numbers<[1], [0], [0], [1], [0, 0, 1, 1], [], []>} : vector<32x28xf32>, vector<28x256xf32>, vector<32x256xf32> -> vector<32x256xf32>
    %275 = vector.extract_strided_slice %271 {offsets = [0, 0], sizes = [32, 1], strides = [1, 1]} : vector<32x2xf32> to vector<32x1xf32>
    %276 = vector.broadcast %275 : vector<32x1xf32> to vector<32x256xf32>
    %277 = arith.mulf %274, %276 : vector<32x256xf32>
    %278 = vector.extract_strided_slice %271 {offsets = [0, 1], sizes = [32, 1], strides = [1, 1]} : vector<32x2xf32> to vector<32x1xf32>
    %279 = vector.broadcast %278 : vector<32x1xf32> to vector<32x256xf32>
    %280 = arith.addf %277, %279 : vector<32x256xf32>
    %cst_191 = arith.constant 0.000000e+00 : f32
    %281 = vector.broadcast %cst_191 : f32 to vector<32x256xf32>
    %282 = arith.maximumf %280, %281 : vector<32x256xf32>
    %c0_192 = arith.constant 0 : index
    %c0_193 = arith.constant 0 : index
    %c0_194 = arith.constant 0 : index
    %283 = vector.load %arg18[%c0_192, %c0_193, %c0_194] : memref<1x32x256xf32, #tpu.memory_space<vmem>>, vector<1x32x256xf32>
    %284 = vector.shape_cast %283 : vector<1x32x256xf32> to vector<32x256xf32>
    %285 = arith.addf %284, %282 : vector<32x256xf32>
    %c0_195 = arith.constant 0 : index
    %c0_196 = arith.constant 0 : index
    %c0_197 = arith.constant 0 : index
    %286 = vector.load %arg18[%c0_195, %c0_196, %c0_197] : memref<1x32x256xf32, #tpu.memory_space<vmem>>, vector<1x32x256xf32>
    %287 = vector.shape_cast %286 : vector<1x32x256xf32> to vector<32x256xf32>
    %288 = vector.shape_cast %285 : vector<32x256xf32> to vector<1x32x256xf32>
    tpu.vector_store %arg18[%c0_195, %c0_196, %c0_197], %288 {strides = array<i32>} : memref<1x32x256xf32, #tpu.memory_space<vmem>>, vector<1x32x256xf32>,
    return
  }
  func.func @transform_0(%arg0: i32) -> (i32, i32, i32) {
    %c0_i32 = arith.constant 0 : i32
    %c0_i32_0 = arith.constant 0 : i32
    %c0_i32_1 = arith.constant 0 : i32
    return %arg0, %c0_i32, %c0_i32_0 : i32, i32, i32
  }
  func.func @transform_1(%arg0: i32) -> (i32, i32) {
    %c0_i32 = arith.constant 0 : i32
    %c0_i32_0 = arith.constant 0 : i32
    %c0_i32_1 = arith.constant 0 : i32
    return %c0_i32, %c0_i32_0 : i32, i32
  }
  func.func @transform_2(%arg0: i32) -> (i32, i32) {
    %c0_i32 = arith.constant 0 : i32
    %c0_i32_0 = arith.constant 0 : i32
    %c0_i32_1 = arith.constant 0 : i32
    return %c0_i32, %c0_i32_0 : i32, i32
  }
  func.func @transform_3(%arg0: i32) -> (i32, i32) {
    %c0_i32 = arith.constant 0 : i32
    %c0_i32_0 = arith.constant 0 : i32
    %c0_i32_1 = arith.constant 0 : i32
    return %c0_i32, %c0_i32_0 : i32, i32
  }
  func.func @transform_4(%arg0: i32) -> (i32, i32) {
    %c0_i32 = arith.constant 0 : i32
    %c0_i32_0 = arith.constant 0 : i32
    %c0_i32_1 = arith.constant 0 : i32
    return %c0_i32, %c0_i32_0 : i32, i32
  }
  func.func @transform_5(%arg0: i32) -> (i32, i32) {
    %c0_i32 = arith.constant 0 : i32
    %c0_i32_0 = arith.constant 0 : i32
    %c0_i32_1 = arith.constant 0 : i32
    return %c0_i32, %c0_i32_0 : i32, i32
  }
  func.func @transform_6(%arg0: i32) -> (i32, i32) {
    %c0_i32 = arith.constant 0 : i32
    %c0_i32_0 = arith.constant 0 : i32
    %c0_i32_1 = arith.constant 0 : i32
    return %c0_i32, %c0_i32_0 : i32, i32
  }
  func.func @transform_7(%arg0: i32) -> (i32, i32) {
    %c0_i32 = arith.constant 0 : i32
    %c0_i32_0 = arith.constant 0 : i32
    %c0_i32_1 = arith.constant 0 : i32
    return %c0_i32, %c0_i32_0 : i32, i32
  }
  func.func @transform_8(%arg0: i32) -> (i32, i32) {
    %c0_i32 = arith.constant 0 : i32
    %c0_i32_0 = arith.constant 0 : i32
    %c0_i32_1 = arith.constant 0 : i32
    return %c0_i32, %c0_i32_0 : i32, i32
  }
  func.func @transform_9(%arg0: i32) -> (i32, i32) {
    %c0_i32 = arith.constant 0 : i32
    %c0_i32_0 = arith.constant 0 : i32
    %c0_i32_1 = arith.constant 0 : i32
    return %c0_i32, %c0_i32_0 : i32, i32
  }
  func.func @transform_10(%arg0: i32) -> (i32, i32) {
    %c0_i32 = arith.constant 0 : i32
    %c0_i32_0 = arith.constant 0 : i32
    %c0_i32_1 = arith.constant 0 : i32
    return %c0_i32, %c0_i32_0 : i32, i32
  }
  func.func @transform_11(%arg0: i32) -> (i32, i32) {
    %c0_i32 = arith.constant 0 : i32
    %c0_i32_0 = arith.constant 0 : i32
    %c0_i32_1 = arith.constant 0 : i32
    return %c0_i32, %c0_i32_0 : i32, i32
  }
  func.func @transform_12(%arg0: i32) -> (i32, i32) {
    %c0_i32 = arith.constant 0 : i32
    %c0_i32_0 = arith.constant 0 : i32
    %c0_i32_1 = arith.constant 0 : i32
    return %c0_i32, %c0_i32_0 : i32, i32
  }
  func.func @transform_13(%arg0: i32) -> (i32, i32) {
    %c0_i32 = arith.constant 0 : i32
    %c0_i32_0 = arith.constant 0 : i32
    %c0_i32_1 = arith.constant 0 : i32
    return %c0_i32, %c0_i32_0 : i32, i32
  }
  func.func @transform_14(%arg0: i32) -> (i32, i32) {
    %c0_i32 = arith.constant 0 : i32
    %c0_i32_0 = arith.constant 0 : i32
    %c0_i32_1 = arith.constant 0 : i32
    return %c0_i32, %c0_i32_0 : i32, i32
  }
  func.func @transform_15(%arg0: i32) -> (i32, i32) {
    %c0_i32 = arith.constant 0 : i32
    %c0_i32_0 = arith.constant 0 : i32
    %c0_i32_1 = arith.constant 0 : i32
    return %c0_i32, %c0_i32_0 : i32, i32
  }
  func.func @transform_16(%arg0: i32) -> (i32, i32) {
    %c0_i32 = arith.constant 0 : i32
    %c0_i32_0 = arith.constant 0 : i32
    %c0_i32_1 = arith.constant 0 : i32
    return %c0_i32, %c0_i32_0 : i32, i32
  }
  func.func @transform_17(%arg0: i32) -> (i32, i32, i32) {
    %c0_i32 = arith.constant 0 : i32
    %c0_i32_0 = arith.constant 0 : i32
    %c0_i32_1 = arith.constant 0 : i32
    return %arg0, %c0_i32, %c0_i32_0 : i32, i32, i32
  }
}

</mosaic_0001>

<bundles_post_ra>
// kernel: gcm_forward.1
= control target key start
LH: loop header
LB: loop body
LE: loop exit
PB: predicated region body
PF: predicated region fallthrough
CT: control target
= control target key end

     0   :  { %s3810_s0 = inlined_call_operand.vmem [shape: f32[2,4,256], index: 0, kind: input, shape index: {}]   ;;  %s3811_s1 = inlined_call_operand.hbm [shape: f32[4,4], index: 1, kind: input, shape index: {}]   ;;  %s3812_s2 = inlined_call_operand.vmem [shape: f32[4,2], index: 2, kind: input, shape index: {}]   ;;  %s3813_s3 = inlined_call_operand.vmem [shape: f32[32,28], index: 3, kind: input, shape index: {}]   ;;  %s3814_s4 = inlined_call_operand.vmem [shape: f32[32,2], index: 4, kind: input, shape index: {}]   ;;  %s3815_s5 = inlined_call_operand.hbm [shape: f32[4,32], index: 5, kind: input, shape index: {}]   ;;  %s3816_s6 = inlined_call_operand.vmem [shape: f32[4,2], index: 6, kind: input, shape index: {}]   ;;  %s3817_s7 = inlined_call_operand.hbm [shape: f32[32,28], index: 7, kind: input, shape index: {}]   ;;  %s3818_s8 = inlined_call_operand.vmem [shape: f32[32,2], index: 8, kind: input, shape index: {}]   ;;  %s3819_s9 = inlined_call_operand.hbm [shape: f32[4,4], index: 9, kind: input, shape index: {}]   ;;  %s3820_s10 = inlined_call_operand.vmem [shape: f32[4,2], index: 10, kind: input, shape index: {}]   ;;  %s3821_s11 = inlined_call_operand.hbm [shape: f32[32,28], index: 11, kind: input, shape index: {}]   ;;  %s3822_s12 = inlined_call_operand.vmem [shape: f32[32,2], index: 12, kind: input, shape index: {}]   ;;  %s3823_s13 = inlined_call_operand.hbm [shape: f32[4,32], index: 13, kind: input, shape index: {}]   ;;  %s3824_s14 = inlined_call_operand.vmem [shape: f32[4,2], index: 14, kind: input, shape index: {}]   ;;  %s3825_s15 = inlined_call_operand.hbm [shape: f32[32,28], index: 15, kind: input, shape index: {}]   ;;  %s3826_s16 = inlined_call_operand.vmem [shape: f32[32,2], index: 16, kind: input, shape index: {}]   ;;  %s3827_s17 = inlined_call_operand.vmem [shape: f32[2,32,256], index: 17, kind: output, shape index: {}]  }
   0x1   :  { %3835 = sst [smem:[#allocation20_spill]] %s3810_s0 }
   0x2   :  { %3836 = sst [smem:[#allocation21_spill]] %s3811_s1 }
   0x3   :  { %3837 = sst [smem:[#allocation22_spill]] %s3815_s5 }
   0x4   :  { %3838 = sst [smem:[#allocation23_spill]] %s3819_s9 }
   0x5   :  { %3839 = sst [smem:[#allocation24_spill]] %s3826_s16 }
   0x6   :  { %3840 = sst [smem:[#allocation25_spill]] %s3827_s17 }
   0x7   :  { %22 = vsyncpa [#allocation5], 0 }
   0x8   :  { %23 = vsyncpa [#allocation7], 0 }
   0x9   :  { %24 = vsyncpa [#allocation10], 0 }
   0xa   :  { %25 = vsyncpa [#allocation13], 0  ;;  %s3167_s24 = smov 0  }
   0xb LB: > { %3841 = sst [smem:[#allocation19_spill]] %s3049_s24  ;;  %s3051_s25 = smov [#allocation6]   ;;  %s3049_s24 = sphi %s3167_s24, %s31_s24  }
   0xc   : > { %s457_s26 = sshll.u32 %s3051_s25, 4  ;;  %s3173_s27 = sadd.s32 4294967295, %s3049_s24   ;;  %s3178_s26 = int_to_ptr.vmem [resolvable:$true] %s457_s26 }
   0xd   : > { %p2575_p0 = scmp.ge.s32.totalorder %s3049_s24, 1  ;;  %p424_p1 = scmp.lt.s32.totalorder %s3049_s24, 3 }
   0xe   : > { %p3831_p2 = scmp.eq.s32.totalorder %s3173_s27, 0  ;;  %s3052_s29 = smov [#allocation9]  }
   0xf   : > { %p3180_p3 = pnand %p2575_p0, %p424_p1  ;;  %s487_s0 = sshll.u32 %s3052_s29, 4  ;;  %s3186_s0 = int_to_ptr.vmem [resolvable:$true] %s487_s0 }
  0x10   : > { %s3053_s30 = smov [#allocation12]   ;;  %s3054_s1 = smov [#allocation4]  }
  0x11   : > { %s3842_s28 = scalar_select %p3180_p3, 1, 0 }
  0x12   : > { %p2728_p4 = pneg %p3180_p3  ;;  %s517_s18 = sshll.u32 %s3053_s30, 4  ;;  %s3194_s18 = int_to_ptr.vmem [resolvable:$true] %s517_s18 }
  0x13   : > { %s437_s20 = sshll.u32 %s3054_s1, 4  ;;  %s3844_s5 = sld [smem:[#allocation22_spill]]  ;;  %s3196_s20 = int_to_ptr.vmem [resolvable:$true] %s437_s20 }
  0x14   : > { %p3190_p5 = pnand %p3831_p2, %p2728_p4 }
  0x16   : > { %p3206_p7 = pneg %p3190_p5 }
  0x19   : > { %s2831_s23 = scalar_lea.hbm %s3844_s5, 64 }
  0x1a   : > { %p2832_p6 = scmp.ne.s32.totalorder %s3844_s5, %s2831_s23  ;;  %p2838_p10 = scmp.lt.u32.totalorder %s2831_s23, %s3844_s5 }
  0x1c   : > { %p2834_p8 = pnand %p3206_p7, %p2832_p6 }
  0x1e   : > { %p2835_p9 = pneg %p2834_p8 }
  0x20   : > { %p2840_p11 = pnand %p2838_p10, %p2835_p9 }
  0x22   : > { %2843 = shalt.err (!%p2840_p11)
}
  0x23   : > { %s2844_s21 = scalar_lea.vmem %s3178_s26, 64  ;;  %p2852_p1 = scmp.lt.s32.totalorder %s3178_s26, %s3178_s26 }
  0x24   : > { %p2845_p12 = scmp.ne.s32.totalorder %s3178_s26, %s2844_s21  ;;  %p2853_p4 = scmp.lt.s32.totalorder %s2844_s21, %s2844_s21 }
  0x26   : > { %p2847_p13 = pnand %p2845_p12, %p3206_p7  ;;  %p2854_p6 = por %p2853_p4, %p2852_p1 }
  0x28   : > { %p2848_p0 = pneg %p2847_p13 }
  0x2a   : > { %p2855_p8 = pnand %p2854_p6, %p2848_p0 }
  0x2c   : > { %2858 = shalt.err (!%p2855_p8)
}
  0x2d   : > { %2734 = dma.hbm_to_vmem [thread:$0]  (!%p3190_p5), %s3844_s5, 64, %s3178_s26, [#allocation7]  }
  0x2e   : > { %s3846_s9 = sld [smem:[#allocation23_spill]] }
  0x34   : > { %s2859_s29 = scalar_lea.hbm %s3846_s9, 64 }
  0x35   : > { %p2860_p9 = scmp.ne.s32.totalorder %s3846_s9, %s2859_s29  ;;  %p2866_p12 = scmp.lt.u32.totalorder %s2859_s29, %s3846_s9 }
  0x37   : > { %p2862_p10 = pnand %p2860_p9, %p3206_p7 }
  0x39   : > { %p2863_p11 = pneg %p2862_p10 }
  0x3b   : > { %p2868_p13 = pnand %p2866_p12, %p2863_p11 }
  0x3d   : > { %2871 = shalt.err (!%p2868_p13)
}
  0x3e   : > { %s2872_s26 = scalar_lea.vmem %s3186_s0, 64  ;;  %p2880_p6 = scmp.lt.s32.totalorder %s3186_s0, %s3186_s0 }
  0x3f   : > { %p2873_p0 = scmp.ne.s32.totalorder %s3186_s0, %s2872_s26  ;;  %p2881_p8 = scmp.lt.s32.totalorder %s2872_s26, %s2872_s26 }
  0x41   : > { %p2875_p1 = pnand %p2873_p0, %p3206_p7  ;;  %p2882_p9 = por %p2881_p8, %p2880_p6 }
  0x43   : > { %p2876_p4 = pneg %p2875_p1 }
  0x45   : > { %p2883_p10 = pnand %p2882_p9, %p2876_p4 }
  0x47   : > { %2886 = shalt.err (!%p2883_p10)
}
  0x48   : > { %2740 = dma.hbm_to_vmem [thread:$0]  (!%p3190_p5), %s3846_s9, 64, %s3186_s0, [#allocation10]  }
  0x49   : > { %s2887_s23 = scalar_lea.hbm %s3823_s13, 64 }
  0x4a   : > { %p2888_p11 = scmp.ne.s32.totalorder %s3823_s13, %s2887_s23  ;;  %p2894_p0 = scmp.lt.u32.totalorder %s2887_s23, %s3823_s13 }
  0x4c   : > { %p2890_p12 = pnand %p2888_p11, %p3206_p7 }
  0x4e   : > { %p2891_p13 = pneg %p2890_p12 }
  0x50   : > { %p2896_p1 = pnand %p2894_p0, %p2891_p13 }
  0x52   : > { %2899 = shalt.err (!%p2896_p1)
}
  0x53   : > { %s2900_s0 = scalar_lea.vmem %s3194_s18, 64  ;;  %p2908_p9 = scmp.lt.s32.totalorder %s3194_s18, %s3194_s18 }
  0x54   : > { %p2901_p4 = scmp.ne.s32.totalorder %s3194_s18, %s2900_s0  ;;  %p2909_p10 = scmp.lt.s32.totalorder %s2900_s0, %s2900_s0 }
  0x56   : > { %p2903_p6 = pnand %p2901_p4, %p3206_p7  ;;  %p2910_p11 = por %p2909_p10, %p2908_p9 }
  0x58   : > { %p2904_p8 = pneg %p2903_p6 }
  0x5a   : > { %p2911_p12 = pnand %p2910_p11, %p2904_p8 }
  0x5c   : > { %2914 = shalt.err (!%p2911_p12)
}
  0x5d   : > { %2746 = dma.hbm_to_vmem [thread:$0]  (!%p3190_p5), %s3823_s13, 64, %s3194_s18, [#allocation13]  }
  0x5e   : > { %s3847_s22 = sld [smem:[#allocation21_spill]] }
  0x64   : > { %s2915_s23 = scalar_lea.hbm %s3847_s22, 64 }
  0x65   : > { %p2916_p13 = scmp.ne.s32.totalorder %s3847_s22, %s2915_s23  ;;  %p2922_p4 = scmp.lt.u32.totalorder %s2915_s23, %s3847_s22 }
  0x67   : > { %p2918_p0 = pnand %p2916_p13, %p3206_p7 }
  0x69   : > { %p2919_p1 = pneg %p2918_p0 }
  0x6b   : > { %p2924_p6 = pnand %p2922_p4, %p2919_p1 }
  0x6d   : > { %2927 = shalt.err (!%p2924_p6)
}
  0x6e   : > { %s2928_s18 = scalar_lea.vmem %s3196_s20, 64  ;;  %p2936_p11 = scmp.lt.s32.totalorder %s3196_s20, %s3196_s20 }
  0x6f   : > { %p2929_p8 = scmp.ne.s32.totalorder %s3196_s20, %s2928_s18  ;;  %p2937_p12 = scmp.lt.s32.totalorder %s2928_s18, %s2928_s18 }
  0x71   : > { %p2931_p9 = pnand %p2929_p8, %p3206_p7  ;;  %p2938_p13 = por %p2937_p12, %p2936_p11 }
  0x73   : > { %p2932_p10 = pneg %p2931_p9 }
  0x75   : > { %p2939_p0 = pnand %p2938_p13, %p2932_p10 }
  0x77   : > { %2942 = shalt.err (!%p2939_p0)
}
  0x78   : > { %2731 = dma.hbm_to_vmem [thread:$0]  (!%p3190_p5), %s3847_s22, 64, %s3196_s20, [#allocation5]  }
  0x79   : > { %s3055_s16 = smov [#allocation8]   ;;  %s2943_s25 = scalar_lea.hbm %s3817_s7, 512 }
  0x7a   : > { %s470_s17 = sshll.u32 %s3055_s16, 4  ;;  %p2944_p1 = scmp.ne.s32.totalorder %s3817_s7, %s2943_s25  ;;  %s471_s17 = int_to_ptr.vmem [resolvable:$true] %s470_s17 }
  0x7b   : > { %p2950_p8 = scmp.lt.u32.totalorder %s2943_s25, %s3817_s7 }
  0x7c   : > { %p2946_p4 = pnand %p2944_p1, %p3206_p7 }
  0x7e   : > { %p2947_p6 = pneg %p2946_p4 }
  0x80   : > { %p2952_p9 = pnand %p2950_p8, %p2947_p6 }
  0x82   : > { %2955 = shalt.err (!%p2952_p9)
}
  0x83   : > { %s2956_s20 = scalar_lea.vmem %s471_s17, 512  ;;  %p2964_p13 = scmp.lt.s32.totalorder %s471_s17, %s471_s17 }
  0x84   : > { %p2957_p10 = scmp.ne.s32.totalorder %s471_s17, %s2956_s20  ;;  %p2965_p0 = scmp.lt.s32.totalorder %s2956_s20, %s2956_s20 }
  0x86   : > { %p2959_p11 = pnand %p2957_p10, %p3206_p7  ;;  %p2966_p2 = por %p2965_p0, %p2964_p13 }
  0x88   : > { %p2960_p12 = pneg %p2959_p11 }
  0x8a   : > { %p2967_p3 = pnand %p2966_p2, %p2960_p12 }
  0x8c   : > { %2970 = shalt.err (!%p2967_p3)
}
  0x8d   : > { %s3056_s0 = smov 128   ;;  %s3057_s26 = smov 8  }
  0x8e   : > { %2737 = dma.hbm_to_vmem [thread:$0]  (!%p3190_p5), %s3817_s7, 512, %s471_s17, [#allocation7], %s3056_s0, %s3056_s0, %s3057_s26  }
  0x8f   : > { %s3058_s23 = smov [#allocation11]   ;;  %s3059_s29 = smov [#allocation14]  }
  0x90   : > { %s500_s25 = sshll.u32 %s3058_s23, 4  ;;  %s530_s1 = sshll.u32 %s3059_s29, 4  ;;  %s501_s25 = int_to_ptr.vmem [resolvable:$true] %s500_s25  ;;  %s3317_s1 = int_to_ptr.vmem [resolvable:$true] %s530_s1 }
  0x91   : > { %s2971_s20 = scalar_lea.hbm %s3821_s11, 512 }
  0x92   : > { %p2972_p2 = scmp.ne.s32.totalorder %s3821_s11, %s2971_s20  ;;  %p2978_p4 = scmp.lt.u32.totalorder %s2971_s20, %s3821_s11 }
  0x94   : > { %p2974_p3 = pnand %p2972_p2, %p3206_p7 }
  0x96   : > { %p2975_p1 = pneg %p2974_p3 }
  0x98   : > { %p2980_p6 = pnand %p2978_p4, %p2975_p1 }
  0x9a   : > { %2983 = shalt.err (!%p2980_p6)
}
  0x9b   : > { %s2984_s24 = scalar_lea.vmem %s501_s25, 512  ;;  %p2992_p11 = scmp.lt.s32.totalorder %s501_s25, %s501_s25 }
  0x9c   : > { %p2985_p8 = scmp.ne.s32.totalorder %s501_s25, %s2984_s24  ;;  %p2993_p12 = scmp.lt.s32.totalorder %s2984_s24, %s2984_s24 }
  0x9e   : > { %p2987_p9 = pnand %p2985_p8, %p3206_p7  ;;  %p2994_p13 = por %p2993_p12, %p2992_p11 }
  0xa0   : > { %p2988_p10 = pneg %p2987_p9 }
  0xa2   : > { %p2995_p0 = pnand %p2994_p13, %p2988_p10 }
  0xa4   : > { %2998 = shalt.err (!%p2995_p0)
}
  0xa5   : > { %2743 = dma.hbm_to_vmem [thread:$0]  (!%p3190_p5), %s3821_s11, 512, %s501_s25, [#allocation10], %s3056_s0, %s3056_s0, %s3057_s26  }
  0xa6   : > { %s2999_s21 = scalar_lea.hbm %s3825_s15, 512 }
  0xa7   : > { %p3000_p2 = scmp.ne.s32.totalorder %s3825_s15, %s2999_s21  ;;  %p3006_p4 = scmp.lt.u32.totalorder %s2999_s21, %s3825_s15 }
  0xa9   : > { %p3002_p3 = pnand %p3000_p2, %p3206_p7 }
  0xab   : > { %p3003_p1 = pneg %p3002_p3 }
  0xad   : > { %p3008_p6 = pnand %p3006_p4, %p3003_p1 }
  0xaf   : > { %3011 = shalt.err (!%p3008_p6)
}
  0xb0   : > { %s3012_s25 = scalar_lea.vmem %s3317_s1, 512  ;;  %p3020_p11 = scmp.lt.s32.totalorder %s3317_s1, %s3317_s1 }
  0xb1   : > { %p3013_p8 = scmp.ne.s32.totalorder %s3317_s1, %s3012_s25  ;;  %p3021_p12 = scmp.lt.s32.totalorder %s3012_s25, %s3012_s25 }
  0xb3   : > { %p3015_p9 = pnand %p3013_p8, %p3206_p7  ;;  %p3022_p13 = por %p3021_p12, %p3020_p11 }
  0xb5   : > { %p3016_p10 = pneg %p3015_p9 }
  0xb7   : > { %p3023_p0 = pnand %p3022_p13, %p3016_p10 }
  0xb9   : > { %3026 = shalt.err (!%p3023_p0)
}
  0xba   : > { %2749 = dma.hbm_to_vmem [thread:$0]  (!%p3190_p5), %s3825_s15, 512, %s3317_s1, [#allocation13], %s3056_s0, %s3056_s0, %s3057_s26  }
  0xbb   : > { %p3848_p2 = scmp.ne.s32.totalorder %s3842_s28, 0 }
  0xbc   : > { %p3849_p7 = scmp.eq.s32.totalorder (!%p3848_p2), %s3173_s27, 0 }
  0xbd   : > { %557 = sbr.rel (%p3848_p2) target bundleno = 2132 (0x854), region = 88 }
  0xc4   : > { %3032 = dma.done.wait (%p3849_p7), [#allocation5], 64   ;;  %p3850_p3 = pmov %p3849_p7 }
  0xc6   : > { %3034 = vsyncadd (%p3850_p3), [#allocation5], 4294967232  ;;  %p3851_p1 = pmov %p3850_p3 }
  0xc8   : > { %3036 = dma.done.wait (%p3851_p1), [#allocation7], 576   ;;  %p3852_p4 = pmov %p3851_p1 }
  0xc9   : > { %p3853_p6 = pmov %p3851_p1 }
  0xca   : > { %3038 = vsyncadd (%p3852_p4), [#allocation7], 4294966720 }
  0xcb   : > { %3040 = dma.done.wait (%p3853_p6), [#allocation10], 576   ;;  %p3854_p5 = pmov %p3851_p1 }
  0xcc   : > { %p3855_p8 = pmov %p3851_p1 }
  0xcd   : > { %3042 = vsyncadd (%p3854_p5), [#allocation10], 4294966720 }
  0xce   : > { %3044 = dma.done.wait (%p3855_p8), [#allocation13], 576   ;;  %p3856_p9 = pmov %p3851_p1 }
  0xcf   : > { %p633_p10 = scmp.lt.s32.totalorder %s3173_s27, 1  ;;  %v3060_v0 = vmov 0.0   ;;  %v3061_v1 = vmov 0   ;;  %s3857_s0 = sld [smem:[#allocation20_spill]]  ;;  %vm764_vm0 = vcmask 1043456   ;;  %vm760_vm1 = vcmask 31744  }
  0xd0   : > { %3046 = vsyncadd (%p3856_p9), [#allocation13], 4294966720  ;;  %833 = vmatprep.mubr.f32.mxu0 %v3060_v0  ;;  %643 = vst [vmem:[#allocation2] sm:$0xf] %v3060_v0  ;;  %1075 = vmatprep.mubr.f32.mxu1 %v3060_v0  ;;  %v756_v3 = vld [vmem:[%s3812_s2] sm:$0xf] }
  0xd1   : > { %s3868_s27 = smov (!%p633_p10, %s3173_s27), 1  ;;  %2798 = vset.pattern.permute.xlu0 %v3061_v1  ;;  %2800 = vset.pattern.permute.xlu1 %v3061_v1  ;;  %v757_v5 = vld [vmem:[#allocation4] sm:$0xf]  ;;  %v3062_v6 = vmov 1   ;;  %vm644_vm2 = vcmask 388096   ;;  %s3063_s23 = smov 112  }
  0xd2   : > { %s2642_s28 = sshll.u32 %s3868_s27, 3  ;;  %842 = vperm.xlu0 %2798, %v756_v3   ;;  %645 = vst.msk [vmem:[#allocation2 + $0xc] sm:$0xf] %vm644_vm2, %v3060_v0  ;;  %s3064_s29 = smov 96   ;;  %v976_v29 = vld [vmem:[%s3814_s4] sm:$0xff]  ;;  %v977_v30 = vld [vmem:[%s3814_s4 + $0x8] sm:$0xff] }
  0xd3   : > { %s3065_s21 = smov 16   ;;  %s3066_s18 = smov 48   ;;  %v978_v31 = vld [vmem:[%s3814_s4 + $0x10] sm:$0xff]  ;;  %v1160_v32 = vld [vmem:[%s3816_s6] sm:$0xf]  ;;  %v979_v33 = vld [vmem:[%s3814_s4 + $0x18] sm:$0xff] }
  0xd4   : > { %s3067_s20 = smov 32   ;;  %s3068_s16 = smov 80   ;;  %v1634_v34 = vld [vmem:[%s3820_s10] sm:$0xf]  ;;  %vm951_vm3 = vcmask 785408   ;;  %vm890_vm4 = vcmask 261120  }
  0xd5   : > { %s637_s26 = scalar_lea.vmem %s3857_s0, %s2642_s28  ;;  %vm871_vm5 = vcmask 392192   ;;  %vm3834_vm6 = vcmask 916480   ;;  %vm908_vm7 = vcmask 130048   ;;  %vm3833_vm8 = vcmask 654336   ;;  %s3070_s1 = smov 127  }
  0xd6   : > { %v3397_v2 = vld [vmem:[%s637_s26] sm:$0xff]  ;;  %2799 = vset.pattern.permute.xlu0 %v3062_v6  ;;  %vm3069_vm9 = vmmov 1   ;;  %vm992_vm11 = vcmask 228352   ;;  %s3071_s9 = smov 125   ;;  %s3072_s17 = smov 1  }
  0xd7   : > { %v3404_v4 = vcombine.high %v3397_v2, %v3397_v2  ;;  %848 = vperm.xlu0 %2799, %v756_v3   ;;  %vm3470_vm10 = vmpackc.low %vm764_vm0, %vm3069_vm9  ;;  %s3073_s25 = smov 126   ;;  %s3074_s24 = smov 2  }
  0xd8   : > { %s3075_s5 = smov 3   ;;  %s3860_s26 = sld [smem:[#allocation24_spill]] }
  0xd9   : > { %2608 = vmatprep.subr.msk.mxu0 %vm764_vm0, %v3404_v4  ;;  %v922_v7 = vld [vmem:[#allocation2 + $0xc] sm:$0xf] }
  0xda   : > { %2609 = vmatpush1.msk.msra.mxu0 %vm764_vm0, %v3397_v2  ;;  %930 = vrot.lane.b32.xlu1 %v922_v7, %s3063_s23  ;;  %v2819_v8 = vld [vmem:[#allocation2 + $0xc] ss:$0 sps:$4 sm:$0xff]  }
  0xdb   : > { %2610 = vmatmul.mubr.msk.f32.vlgmr.msra.gmra.mrb[0].mxu0 %vm760_vm1, %v757_v5  ;;  %2801 = vset.pattern.permute.xlu0 %v3061_v1  ;;  %v959_v28 = vld [vmem:[#allocation2 + $0xc] sm:$0xf] }
  0xdc   : > { %1541 = vmatprep.mubr.f32.mxu0 %v3060_v0 }
  0xde   : > { %949 = vrot.lane.b32.xlu1 %v2819_v8, %s3064_s29 }
 0x14c   : > { %v931_v35 = vpop.permute.xlu1 %930 }
 0x150   : > { %v950_v36 = vpop.permute.xlu1 %949 }
 0x151   : > { %v843_v9 = vpop.permute.xlu0 %842 }
 0x156   : > { %v849_v11 = vpop.permute.xlu0 %848 }
 0x1ae   : > { %v835_v10 = vpop.f32.mrb[0].mxu0 }
 0x1af   : > { %v845_v12 = vmul.f32 %v843_v9, %v835_v10  ;;  %v837_v13 = vpop.f32.mrb[1].mxu0 }
 0x1b0   : > { %v846_v14 = vmul.f32 %v843_v9, %v837_v13 }
 0x1b1   : > { %v851_v15 = vadd.f32 %v849_v11, %v845_v12 }
 0x1b2   : > { %v852_v16 = vadd.f32 %v849_v11, %v846_v14 }
 0x1b3   : > { %v853_v17 = vmax.f32 %v851_v15, 0.0 }
 0x1b4   : > { %v854_v18 = vmax.f32 %v852_v16, 0.0 }
 0x1b5   : > { %v2827_v20 = vcombine.low %v853_v17, %v853_v17 }
 0x1b6   : > { %v857_v19 = vcombine.low %v853_v17, %v854_v18  ;;  %v2828_v27 = vcombine.low %v854_v18, %v854_v18 }
 0x1b7   : > { %919 = vst [vmem:[#allocation3 + $0x10] sm:$0xf0] %v2827_v20 }
 0x1b8   : > { %859 = vst [vmem:[#allocation2 + $0x4] sm:$0xff] %v857_v19  ;;  %920 = vst [vmem:[#allocation3 + $0x18] sm:$0xf0] %v857_v19 }
 0x1bf   : > { %v898_v21 = vld [vmem:[#allocation2 + $0x8] sm:$0xf]  ;;  %v878_v23 = vld [vmem:[#allocation2] sm:$0xff] }
 0x1c0   : > { %v861_v22 = vld [vmem:[#allocation2 + $0x8] sm:$0xf]  ;;  %906 = vrot.lane.b32.xlu0 %v898_v21, %s3065_s21  ;;  %v882_v25 = vcombine.low %v878_v23, %v878_v23  ;;  %v864_v26 = vcombine.high %v878_v23, %v878_v23  ;;  %v982_v21 = vld [vmem:[%s3813_s3 + $0x10] sm:$0xff] }
 0x1c1   : > { %869 = vrot.lane.b32.xlu1 %v861_v22, %s3066_s18  ;;  %v2820_v24 = vld [vmem:[#allocation2 + $0x8] ss:$0 sps:$4 sm:$0xff]   ;;  %v983_v22 = vld [vmem:[%s3813_s3 + $0x18] sm:$0xff] }
 0x1c4   : > { %947 = vrot.lane.b32.xlu0 %v857_v19, %s3064_s29 }
 0x1c5   : > { %886 = vrot.lane.b32.xlu1 %v878_v23, %s3067_s20 }
 0x1c8   : > { %888 = vrot.lane.b32.xlu0 %v2820_v24, %s3067_s20 }
 0x1c9   : > { %865 = vrot.lane.b32.xlu1 %v878_v23, %s3066_s18 }
 0x1cc   : > { %926 = vrot.lane.b32.xlu0 %v857_v19, %s3063_s23 }
 0x1cd   : > { %902 = vrot.lane.b32.xlu1 %v878_v23, %s3065_s21  ;;  %v646_v23 = vlaneseq }
 0x1cf   : > { %v647_v24 = vand.u32 127, %v646_v23 }
 0x1d0   : > { %884 = vrot.lane.b32.xlu0 %v882_v25, %s3067_s20 }
 0x1d1   : > { %867 = vrot.lane.b32.xlu1 %v864_v26, %s3066_s18  ;;  %v648_v25 = vadd.s32 128, %v647_v24 }
 0x1d4   : > { %928 = vrot.lane.b32.xlu0 %v2828_v27, %s3063_s23 }
 0x1d5   : > { %904 = vrot.lane.b32.xlu1 %v864_v26, %s3065_s21  ;;  %v653_v26 = vand.u32 15, %v647_v24 }
 0x1d8   : > { %965 = vrot.lane.b32.xlu0 %v2828_v27, %s3068_s16  ;;  %v660_v27 = vand.u32 15, %v648_v25 }
 0x1d9   : > { %967 = vrot.lane.b32.xlu1 %v959_v28, %s3068_s16  ;;  %v697_v28 = vadd.s32 4294967295, %v653_v26 }
 0x1db   : > { %vm699_vm12 = vcmp.ge.s32.totalorder %v697_v28, 0 }
 0x1dc   : > { %963 = vrot.lane.b32.xlu0 %v857_v19, %s3068_s16  ;;  %v980_v19 = vld [vmem:[%s3813_s3] sm:$0xff] }
 0x1dd   : > { %945 = vrot.lane.b32.xlu1 %v2827_v20, %s3064_s29  ;;  %v981_v20 = vld [vmem:[%s3813_s3 + $0x8] sm:$0xff] }
 0x1e0   : > { %1107 = vperm.xlu0 %2801, %v977_v30  }
 0x1e1   : > { %1102 = vperm.xlu1 %2800, %v976_v29  }
 0x1e4   : > { %1112 = vperm.xlu0 %2801, %v978_v31  }
 0x1e5   : > { %2802 = vset.pattern.permute.xlu1 %v3062_v6 }
 0x1e6   : > { %1129 = vperm.xlu1 %2802, %v976_v29   ;;  %v719_v29 = vadd.s32 1, %v653_v26 }
 0x1e8   : > { %2804 = vset.pattern.permute.xlu0 %v3062_v6  ;;  %vm723_vm13 = vcmp.lt.s32.totalorder %v719_v29, 16 }
 0x1e9   : > { %1137 = vperm.xlu0 %2804, %v978_v31   ;;  %v731_v31 = vadd.s32 2, %v653_v26 }
 0x1ea   : > { %1133 = vperm.xlu1 %2802, %v977_v30   ;;  %v673_v30 = vadd.s32 4294967293, %v653_v26 }
 0x1ec   : > { %vm675_vm14 = vcmp.ge.s32.totalorder %v673_v30, 0 }
 0x1ed   : > { %1244 = vperm.xlu0 %2804, %v1160_v32  }
 0x1ee   : > { %2803 = vset.pattern.permute.xlu1 %v3061_v1 }
 0x1ef   : > { %1117 = vperm.xlu1 %2803, %v979_v33  }
 0x1f1   : > { %1718 = vperm.xlu0 %2804, %v1634_v34  }
 0x1f3   : > { %2805 = vset.pattern.permute.xlu1 %v3062_v6 }
 0x1f4   : > { %1141 = vperm.xlu1 %2805, %v979_v33   ;;  %v698_v33 = vadd.s32 4294967295, %v660_v27 }
 0x1f5   : > { %2807 = vset.pattern.permute.xlu0 %v3061_v1 }
 0x1f6   : > { %vm700_vm15 = vcmp.ge.s32.totalorder %v698_v33, 0 }
 0x1f8   : > { %2806 = vset.pattern.permute.xlu1 %v3061_v1 }
 0x1f9   : > { %1238 = vperm.xlu1 %2806, %v1160_v32   ;;  %v685_v32 = vadd.s32 4294967294, %v653_v26 }
 0x1fd   : > { %1712 = vperm.xlu1 %2806, %v1634_v34   ;;  %v720_v34 = vadd.s32 1, %v660_v27 }
 0x1ff   : > { %vm724_vm2 = vcmp.lt.s32.totalorder %v720_v34, 16 }
 0x232   : > { %v907_v37 = vpop.permute.xlu0 %906 }
 0x233   : > { %v870_v38 = vpop.permute.xlu1 %869 }
 0x236   : > { %v948_v39 = vpop.permute.xlu0 %947 }
 0x237   : > { %v887_v40 = vpop.permute.xlu1 %886  ;;  %v953_v41 = vsel %vm951_vm3, %v948_v39, %v950_v36  ;;  %v674_v36 = vadd.s32 4294967293, %v660_v27 }
 0x238   : > { %957 = vst [vmem:[#allocation3 + $0x28] sm:$0xf0] %v953_v41  ;;  %v2602_v41 = vsel %vm723_vm13, 1.0, %v3060_v0 }
 0x239   : > { %vm676_vm9 = vcmp.ge.s32.totalorder %v674_v36, 0 }
 0x23a   : > { %v889_v42 = vpop.permute.xlu0 %888 }
 0x23b   : > { %v866_v43 = vpop.permute.xlu1 %865  ;;  %v892_v44 = vsel %vm890_vm4, %v887_v40, %v889_v42  ;;  %v2603_v42 = vsel %vm724_vm2, 1.0, %v3060_v0  ;;  %vm1310_vm2 = vcmask 15360  }
 0x23c   : > { %896 = vst [vmem:[#allocation3 + $0x8] sm:$0xf0] %v892_v44  ;;  %v2597_v44 = vsel %vm676_vm9, 1.0, %v3060_v0  ;;  %vm1325_vm9 = vcmask 1039360  }
 0x23e   : > { %v927_v45 = vpop.permute.xlu0 %926 }
 0x23f   : > { %v903_v46 = vpop.permute.xlu1 %902 }
 0x242   : > { %v885_v47 = vpop.permute.xlu0 %884 }
 0x243   : > { %v868_v48 = vpop.permute.xlu1 %867  ;;  %v891_v49 = vsel %vm890_vm4, %v885_v47, %v887_v40  ;;  %v2601_v40 = vsel %vm700_vm15, 1.0, %v3060_v0  ;;  %v1362_v47 = vcombine.low %v2602_v41, %v2603_v42 }
 0x244   : > { %v872_v50 = vsel %vm871_vm5, %v866_v43, %v868_v48  ;;  %v873_v51 = vsel %vm871_vm5, %v868_v48, %v870_v38  ;;  %895 = vst [vmem:[#allocation3] sm:$0xf0] %v891_v49  ;;  %v2596_v38 = vsel %vm675_vm14, 1.0, %v3060_v0  ;;  %vm687_vm14 = vcmp.ge.s32.totalorder %v685_v32, 0 }
 0x245   : > { %876 = vst [vmem:[#allocation3] sm:$0xf] %v872_v50  ;;  %877 = vst [vmem:[#allocation3 + $0x8] sm:$0xf] %v873_v51  ;;  %v744_v48 = vadd.s32 3, %v660_v27  ;;  %v2598_v51 = vsel %vm687_vm14, 1.0, %v3060_v0 }
 0x246   : > { %v929_v52 = vpop.permute.xlu0 %928 }
 0x247   : > { %v905_v53 = vpop.permute.xlu1 %904  ;;  %v933_v54 = vsel %vm3834_vm6, %v927_v45, %v929_v52  ;;  %v934_v55 = vsel %vm3834_vm6, %v929_v52, %v931_v35  ;;  %v2600_v35 = vsel %vm699_vm12, 1.0, %v3060_v0  ;;  %v1260_v45 = vcombine.low %v2596_v38, %v2597_v44 }
 0x248   : > { %v909_v56 = vsel %vm908_vm7, %v903_v46, %v905_v53  ;;  %v910_v57 = vsel %vm908_vm7, %v905_v53, %v907_v37  ;;  %937 = vst [vmem:[#allocation3 + $0x20] sm:$0xf] %v933_v54  ;;  %938 = vst [vmem:[#allocation3 + $0x28] sm:$0xf] %v934_v55  ;;  %v743_v37 = vadd.s32 3, %v653_v26  ;;  %v1321_v43 = vcombine.low %v2600_v35, %v2601_v40 }
 0x249   : > { %913 = vst [vmem:[#allocation3 + $0x10] sm:$0xf] %v909_v56  ;;  %914 = vst [vmem:[#allocation3 + $0x18] sm:$0xf] %v910_v57  ;;  %v686_v46 = vadd.s32 4294967294, %v660_v27  ;;  %1261 = vrot.lane.b32.xlu1 %v1260_v45, %s3071_s9  ;;  %vm748_vm15 = vcmp.lt.s32.totalorder %v744_v48, 16 }
 0x24a   : > { %v966_v58 = vpop.permute.xlu0 %965  ;;  %1322 = vrot.lane.b32.xlu0 %v1321_v43, %s3070_s1  ;;  %vm747_vm6 = vcmp.lt.s32.totalorder %v743_v37, 16  ;;  %v2607_v55 = vsel %vm748_vm15, 1.0, %v3060_v0  ;;  %v1161_v45 = vld [vmem:[#allocation6] sm:$0xf] }
 0x24b   : > { %v968_v59 = vpop.permute.xlu1 %967  ;;  %vm688_vm13 = vcmp.ge.s32.totalorder %v686_v46, 0  ;;  %v2606_v53 = vsel %vm747_vm6, 1.0, %v3060_v0  ;;  %vm1294_vm6 = vcmask 1031168  }
 0x24c   : > { %v971_v60 = vsel %vm3833_vm8, %v966_v58, %v968_v59  ;;  %v985_v63 = vld [vmem:[#allocation3 + $0x8] sm:$0xff]  ;;  %v984_v8 = vld [vmem:[#allocation3] sm:$0xff]  ;;  %v2599_v52 = vsel %vm688_vm13, 1.0, %v3060_v0  ;;  %v1419_v57 = vcombine.low %v2606_v53, %v2607_v55 }
 0x24d   : > { %975 = vst [vmem:[#allocation3 + $0x38] sm:$0xf] %v971_v60  ;;  %v1290_v54 = vcombine.low %v2598_v51, %v2599_v52 }
 0x24e   : > { %v964_v61 = vpop.permute.xlu0 %963  ;;  %1363 = vrot.lane.b32.xlu0 %v1362_v47, %s3072_s17  ;;  %v1635_v47 = vld [vmem:[#allocation9] sm:$0xf] }
 0x24f   : > { %v946_v62 = vpop.permute.xlu1 %945  ;;  %v970_v3 = vsel %vm3833_vm8, %v964_v61, %v966_v58  ;;  %v989_v13 = vld [vmem:[#allocation3 + $0x28] sm:$0xff]  ;;  %vm735_vm8 = vcmp.lt.s32.totalorder %v731_v31, 16  ;;  %1291 = vrot.lane.b32.xlu1 %v1290_v54, %s3073_s25 }
 0x250   : > { %v952_v5 = vsel %vm951_vm3, %v946_v62, %v948_v39  ;;  %v987_v7 = vld [vmem:[#allocation3 + $0x18] sm:$0xff]  ;;  %v986_v9 = vld [vmem:[#allocation3 + $0x10] sm:$0xff]  ;;  %974 = vst [vmem:[#allocation3 + $0x30] sm:$0xf] %v970_v3  ;;  %v732_v39 = vadd.s32 2, %v660_v27  ;;  %v2604_v49 = vsel %vm735_vm8, 1.0, %v3060_v0 }
 0x251   : > { %956 = vst [vmem:[#allocation3 + $0x20] sm:$0xf0] %v952_v5  ;;  %v2644_v10 = vpack.c.bf16 %v987_v7, %v985_v63  ;;  %v2646_v11 = vpack.c.bf16 %v986_v9, %v984_v8  ;;  %vm1264_vm8 = vcmask 1022976  }
 0x252   : > { %vm736_vm12 = vcmp.lt.s32.totalorder %v732_v39, 16 }
 0x253   : > { %2645 = vmatprep.subr.bf16.mxu1 %v2644_v10  ;;  %v2605_v50 = vsel %vm736_vm12, 1.0, %v3060_v0  ;;  %1420 = vrot.lane.b32.xlu1 %v1419_v57, %s3075_s5  ;;  %v1387_v57 = vld [vmem:[#allocation2 + $0xc] sm:$0xf]  ;;  %vm3861_vm12 = vcmask 916480  }
 0x254   : > { %2647 = vmatpush1.bf16.msra.mxu1 %v2646_v11  ;;  %v991_v14 = vld [vmem:[#allocation3 + $0x38] sm:$0xf]  ;;  %v1390_v56 = vcombine.low %v2604_v49, %v2605_v50  ;;  %v1359_v50 = vld [vmem:[#allocation2 + $0xc] sm:$0xf] }
 0x255   : > { %v2648_v15 = vpack.c.bf16 %v991_v14, %v989_v13 }
 0x256   : > { %1391 = vrot.lane.b32.xlu0 %v1390_v56, %s3074_s24 }
 0x257   : > { %2650 = vmatprep.subr.msk.bf16.mxu1 %vm3470_vm10, %v2648_v15  ;;  %v990_v17 = vld [vmem:[#allocation3 + $0x30] sm:$0xf] }
 0x258   : > { %v988_v16 = vld [vmem:[#allocation3 + $0x20] sm:$0xff] }
 0x259   : > { %v2651_v18 = vpack.c.bf16 %v990_v17, %v988_v16 }
 0x25b   : > { %2653 = vmatpush1.bf16.msk.msra.mxu1 %vm3470_vm10, %v2651_v18 }
 0x25e   : > { %2613 = vmatmul.mubr.msk.f32.vlgmr.msra.gmra.mrb[0].mxu1 %vm992_vm11, %v980_v19 }
 0x25f   : > { %1081 = vmatprep.mubr.f32.mxu1 %v3060_v0  ;;  %v1108_v60 = vpop.permute.xlu0 %1107 }
 0x260   : > { %v1103_v58 = vpop.permute.xlu1 %1102 }
 0x262   : > { %2614 = vmatmul.mubr.msk.f32.gmra.mrb[2].mxu1 %vm992_vm11, %v981_v20 }
 0x263   : > { %1087 = vmatprep.mubr.f32.mxu1 %v3060_v0  ;;  %v1113_v9 = vpop.permute.xlu0 %1112 }
 0x265   : > { %v1130_v59 = vpop.permute.xlu1 %1129 }
 0x266   : > { %2615 = vmatmul.mubr.msk.f32.gmra.mrb[4].mxu1 %vm992_vm11, %v982_v21 }
 0x267   : > { %1093 = vmatprep.mubr.f32.mxu1 %v3060_v0 }
 0x268   : > { %v1138_v27 = vpop.permute.xlu0 %1137 }
 0x269   : > { %v1134_v5 = vpop.permute.xlu1 %1133 }
 0x26a   : > { %2616 = vmatmul.mubr.msk.f32.gmra.mrb[6].mxu1 %vm992_vm11, %v983_v22 }
 0x26b   : > { %1229 = vmatprep.mubr.f32.mxu1 %v3060_v0 }
 0x26c   : > { %v1245_v43 = vpop.permute.xlu0 %1244 }
 0x26e   : > { %v1118_v15 = vpop.permute.xlu1 %1117 }
 0x270   : > { %v1719_v46 = vpop.permute.xlu0 %1718 }
 0x273   : > { %v1142_v30 = vpop.permute.xlu1 %1141 }
 0x2bc   : > { %v3523_v48 = vpop.permute.xlu0 %1322 }
 0x2c0   : > { %v1364_v49 = vpop.permute.xlu0 %1363 }
 0x2c1   : > { %v1365_v51 = vrot.slane %v1364_v49, 4 }
 0x2c3   : > { %v1370_v52 = vmul.f32 %v1365_v51, %v1359_v50 }
 0x2c5   : > { %1378 = vrot.lane.b32.xlu1 %v1370_v52, %s3070_s1 }
 0x331   : > { %v1077_v61 = vpop.f32.mrb[0].mxu1 }
 0x332   : > { %v1120_v62 = vmul.f32 %v1103_v58, %v1077_v61  ;;  %v1079_v63 = vpop.f32.mrb[1].mxu1 }
 0x333   : > { %v1121_v3 = vmul.f32 %v1103_v58, %v1079_v63 }
 0x334   : > { %v1144_v8 = vadd.f32 %v1130_v59, %v1120_v62  ;;  %v1416_v62 = vld [vmem:[#allocation2 + $0xc] sm:$0xf] }
 0x335   : > { %v1083_v7 = vpop.f32.mrb[2].mxu1  ;;  %v1145_v13 = vadd.f32 %v1130_v59, %v1121_v3  ;;  %v1796_v3 = vld [vmem:[#allocation2 + $0xc] sm:$0xf] }
 0x336   : > { %v1122_v10 = vmul.f32 %v1108_v60, %v1083_v7  ;;  %v1085_v11 = vpop.f32.mrb[3].mxu1  ;;  %v1152_v19 = vmax.f32 %v1144_v8, 0.0  ;;  %v1815_v7 = vld [vmem:[#allocation2 + $0xc] sm:$0xf] }
 0x337   : > { %v1123_v14 = vmul.f32 %v1108_v60, %v1085_v11  ;;  %v1153_v23 = vmax.f32 %v1145_v13, 0.0 }
 0x338   : > { %v1146_v16 = vadd.f32 %v1134_v5, %v1122_v10 }
 0x339   : > { %v1147_v17 = vadd.f32 %v1134_v5, %v1123_v14  ;;  %v1089_v18 = vpop.f32.mrb[4].mxu1  ;;  %v1798_v5 = vmul.f32 %v1796_v3, %v1365_v51 }
 0x33a   : > { %v1154_v20 = vmax.f32 %v1146_v16, 0.0  ;;  %v1124_v21 = vmul.f32 %v1113_v9, %v1089_v18  ;;  %v1091_v22 = vpop.f32.mrb[5].mxu1 }
 0x33b   : > { %v1155_v24 = vmax.f32 %v1147_v17, 0.0  ;;  %v1125_v25 = vmul.f32 %v1113_v9, %v1091_v22 }
 0x33c   : > { %v2656_v26 = vpack.c.bf16 %v1154_v20, %v1152_v19  ;;  %v1148_v31 = vadd.f32 %v1138_v27, %v1124_v21 }
 0x33d   : > { %v1095_v28 = vpop.f32.mrb[6].mxu1  ;;  %v2654_v29 = vpack.c.bf16 %v1155_v24, %v1153_v23  ;;  %v1149_v34 = vadd.f32 %v1138_v27, %v1125_v25 }
 0x33e   : > { %v1126_v32 = vmul.f32 %v1118_v15, %v1095_v28  ;;  %v1097_v33 = vpop.f32.mrb[7].mxu1  ;;  %v1156_v38 = vmax.f32 %v1148_v31, 0.0 }
 0x33f   : > { %v1127_v35 = vmul.f32 %v1118_v15, %v1097_v33  ;;  %2655 = vmatprep.subr.bf16.mxu1 %v2654_v29  ;;  %v1157_v40 = vmax.f32 %v1149_v34, 0.0 }
 0x340   : > { %v1150_v36 = vadd.f32 %v1142_v30, %v1126_v32  ;;  %2657 = vmatpush1.bf16.msra.mxu1 %v2656_v26  ;;  %v3076_v26 = vmov 1.0  }
 0x341   : > { %v1151_v37 = vadd.f32 %v1142_v30, %v1127_v35  ;;  %v1350_v27 = vcombine.low %v3076_v26, %v3076_v26  ;;  %v1854_v26 = vld [vmem:[%s3822_s12 + $0x8] sm:$0xff] }
 0x342   : > { %v1158_v39 = vmax.f32 %v1150_v36, 0.0 }
 0x343   : > { %v1159_v41 = vmax.f32 %v1151_v37, 0.0 }
 0x344   : > { %v2660_v42 = vpack.c.bf16 %v1158_v39, %v1156_v38 }
 0x345   : > { %v2658_v44 = vpack.c.bf16 %v1159_v41, %v1157_v40 }
 0x347   : > { %2659 = vmatprep.subr.bf16.mxu1 %v2658_v44 }
 0x348   : > { %2661 = vmatpush1.bf16.msra.mxu1 %v2660_v42 }
 0x349   : > { %2624 = vmatprep.subr.msk.mxu1 %vm764_vm0, %v3404_v4  ;;  %v1239_v4 = vpop.permute.xlu1 %1238 }
 0x34b   : > { %2617 = vmatmul.mubr.msk.f32.vlgmr.msra.gmra.mrb[8].mxu1 %vm890_vm4, %v1161_v45 }
 0x34c   : > { %2625 = vmatpush1.msk.msra.mxu1 %vm764_vm0, %v3397_v2  ;;  %1703 = vmatprep.mubr.f32.mxu1 %v3060_v0  ;;  %v3529_v2 = vpop.permute.xlu0 %1391  ;;  %vm1340_vm0 = vcmask 7168  }
 0x34d   : > { %v1713_v53 = vpop.permute.xlu1 %1712  ;;  %v3532_v55 = vrot.slane %v3529_v2, 4  ;;  %v1366_v23 = vsel %vm1340_vm0, %v1365_v51, %v1364_v49  ;;  %v1324_v51 = vrot.slane %v3523_v48, 4 }
 0x34f   : > { %2626 = vmatmul.mubr.msk.f32.vlgmr.msra.gmra.mrb[10].mxu1 %vm760_vm1, %v1635_v47  ;;  %v1398_v58 = vmul.f32 %v3532_v55, %v1387_v57  ;;  %v1817_v8 = vmul.f32 %v1815_v7, %v3532_v55  ;;  %vm1279_vm1 = vcmask 23552  }
 0x350   : > { %1951 = vmatprep.mubr.f32.mxu1 %v3060_v0 }
 0x351   : > { %v3527_v54 = vpop.permute.xlu1 %1261  ;;  %v1402_v59 = vcombine.low %v1398_v58, %v1398_v58  ;;  %v1821_v9 = vcombine.low %v1817_v8, %v1817_v8 }
 0x352   : > { %v1263_v41 = vrot.slane %v3527_v54, 4 }
 0x353   : > { %1407 = vrot.lane.b32.xlu1 %v1402_v59, %s3073_s25 }
 0x354   : > { %v1265_v50 = vsel %vm1264_vm8, %v1263_v41, %v3527_v54  ;;  %v1326_v54 = vsel %vm1325_vm9, %v1324_v51, %v3523_v48 }
 0x355   : > { %v1292_v56 = vpop.permute.xlu1 %1291 }
 0x356   : > { %v3548_v34 = vrot.slane %v1292_v56, 4 }
 0x358   : > { %v1295_v42 = vsel %vm1294_vm6, %v3548_v34, %v1292_v56 }
 0x359   : > { %v1421_v60 = vpop.permute.xlu1 %1420 }
 0x35a   : > { %v3535_v61 = vrot.slane %v1421_v60, 4 }
 0x35c   : > { %v1427_v63 = vmul.f32 %v3535_v61, %v1416_v62  ;;  %v1423_v24 = vsel %vm1279_vm1, %v3535_v61, %v1421_v60 }
 0x35e   : > { %1435 = vrot.lane.b32.xlu1 %v1427_v63, %s3071_s9 }
 0x362   : > { %1806 = vrot.lane.b32.xlu1 %v1798_v5, %s3070_s1 }
 0x366   : > { %1826 = vrot.lane.b32.xlu1 %v1821_v9, %s3073_s25 }
 0x41e   : > { %v1231_v10 = vpop.f32.mrb[8].mxu1 }
 0x41f   : > { %v1241_v11 = vmul.f32 %v1239_v4, %v1231_v10  ;;  %v1233_v13 = vpop.f32.mrb[9].mxu1 }
 0x420   : > { %v1242_v14 = vmul.f32 %v1239_v4, %v1233_v13 }
 0x421   : > { %v1247_v15 = vadd.f32 %v1245_v43, %v1241_v11 }
 0x422   : > { %v1248_v16 = vadd.f32 %v1245_v43, %v1242_v14  ;;  %v1705_v17 = vpop.f32.mrb[10].mxu1 }
 0x423   : > { %v1249_v18 = vmax.f32 %v1247_v15, 0.0  ;;  %v1715_v19 = vmul.f32 %v1713_v53, %v1705_v17  ;;  %v1707_v20 = vpop.f32.mrb[11].mxu1 }
 0x424   : > { %v1250_v21 = vmax.f32 %v1248_v16, 0.0  ;;  %v1716_v22 = vmul.f32 %v1713_v53, %v1707_v20  ;;  %v1394_v53 = vsel %vm1310_vm2, %v3532_v55, %v3529_v2  ;;  %v1835_v16 = vld [vmem:[#allocation2 + $0xc] sm:$0xf] }
 0x425   : > { %v1721_v25 = vadd.f32 %v1719_v46, %v1715_v19 }
 0x426   : > { %v1253_v28 = vcombine.low %v1249_v18, %v1250_v21  ;;  %v1722_v29 = vadd.f32 %v1719_v46, %v1716_v22  ;;  %v1837_v18 = vmul.f32 %v1835_v16, %v3535_v61 }
 0x427   : > { %v1723_v30 = vmax.f32 %v1721_v25, 0.0 }
 0x428   : > { %1255 = vst [vmem:[#allocation2 + $0x4] sm:$0xff] %v1253_v28  ;;  %v3546_v31 = vmul.f32 %v1423_v24, %v1253_v28  ;;  %v1724_v32 = vmax.f32 %v1722_v29, 0.0  ;;  %v1369_v33 = vmul.f32 %v1366_v23, %v1253_v28  ;;  %v1352_v35 = vmul.f32 %v1350_v27, %v1253_v28  ;;  %v1856_v29 = vld [vmem:[%s3822_s12 + $0x18] sm:$0xff] }
 0x429   : > { %v1397_v56 = vmul.f32 %v1394_v53, %v1253_v28  ;;  %v1379_v28 = vpop.permute.xlu1 %1378 }
 0x42a   : > { %v3550_v36 = vcombine.low %v1723_v30, %v1724_v32  ;;  %v1354_v37 = vcombine.low %v1352_v35, %v1352_v35  ;;  %1357 = vst [vmem:[#allocation3 + $0x18] sm:$0xf0] %v1352_v35  ;;  %v1373_v5 = vcombine.high %v1369_v33, %v1369_v33  ;;  %v1430_v8 = vcombine.high %v3546_v31, %v3546_v31 }
 0x42b   : > { %v1401_v48 = vcombine.low %v1397_v56, %v1397_v56 }
 0x42c   : > { %v3553_v38 = vmul.f32 %v3550_v36, %v1366_v23  ;;  %v3556_v39 = vmul.f32 %v3550_v36, %v1423_v24  ;;  %v3559_v40 = vmul.f32 %v3550_v36, %v1350_v27  ;;  %1356 = vst [vmem:[#allocation3 + $0x10] sm:$0xf0] %v1354_v37  ;;  %v1816_v19 = vmul.f32 %v3550_v36, %v1394_v53  ;;  %v1853_v23 = vld [vmem:[%s3822_s12] sm:$0xff]  ;;  %v1855_v27 = vld [vmem:[%s3822_s12 + $0x10] sm:$0xff] }
 0x42d   : > { %v1408_v30 = vpop.permute.xlu1 %1407 }
 0x42e   : > { %v1820_v21 = vcombine.low %v1816_v19, %v1816_v19  ;;  %v1801_v24 = vcombine.high %v3553_v38, %v3553_v38  ;;  %v1840_v25 = vcombine.high %v3556_v39, %v3556_v39 }
 0x42f   : > { %v1257_v43 = vld [vmem:[#allocation2 + $0x8] sm:$0xf]  ;;  %v1286_v44 = vld [vmem:[#allocation2] sm:$0xff] }
 0x430   : > { %v1318_v45 = vld [vmem:[#allocation2 + $0x8] sm:$0xf]  ;;  %v1269_v46 = vmul.f32 %v1263_v41, %v1257_v43  ;;  %v1298_v47 = vmul.f32 %v1295_v42, %v1286_v44  ;;  %v1268_v4 = vmul.f32 %v1286_v44, %v1265_v50  ;;  %v1329_v57 = vmul.f32 %v1326_v54, %v1286_v44 }
 0x431   : > { %v1287_v49 = vld [vmem:[#allocation2 + $0x8] sm:$0xf]  ;;  %v1330_v52 = vmul.f32 %v1324_v51, %v1318_v45  ;;  %v1436_v32 = vpop.permute.xlu1 %1435 }
 0x432   : > { %1729 = vst [vmem:[#allocation2 + $0x4] sm:$0xff] %v3550_v36  ;;  %1277 = vrot.lane.b32.xlu0 %v1269_v46, %s3075_s5  ;;  %1306 = vrot.lane.b32.xlu1 %v1298_v47, %s3074_s24  ;;  %v1272_v58 = vcombine.high %v1268_v4, %v1268_v4  ;;  %v1333_v59 = vcombine.high %v1329_v57, %v1329_v57 }
 0x433   : > { %v1299_v2 = vmul.f32 %v3548_v34, %v1287_v49  ;;  %v1302_v63 = vcombine.low %v1298_v47, %v1298_v47 }
 0x435   : > { %v1303_v55 = vcombine.low %v1299_v2, %v1299_v2 }
 0x436   : > { %1338 = vrot.lane.b32.xlu0 %v1330_v52, %s3072_s17  ;;  %1273 = vrot.lane.b32.xlu1 %v1268_v4, %s3075_s5 }
 0x439   : > { %v1749_v60 = vld [vmem:[#allocation2] sm:$0xff]  ;;  %v1731_v9 = vld [vmem:[#allocation2 + $0x8] sm:$0xf] }
 0x43a   : > { %1405 = vrot.lane.b32.xlu0 %v1397_v56, %s3073_s25  ;;  %1334 = vrot.lane.b32.xlu1 %v1329_v57, %s3072_s17  ;;  %v1751_v62 = vmul.f32 %v1749_v60, %v1295_v42  ;;  %v1732_v3 = vmul.f32 %v1749_v60, %v1265_v50  ;;  %v1771_v7 = vmul.f32 %v1749_v60, %v1326_v54  ;;  %v1770_v13 = vld [vmem:[#allocation2 + $0x8] sm:$0xf] }
 0x43b   : > { %v1733_v11 = vmul.f32 %v1731_v9, %v1263_v41  ;;  %v1772_v15 = vmul.f32 %v1770_v13, %v1324_v51  ;;  %v1750_v17 = vld [vmem:[#allocation2 + $0x8] sm:$0xf] }
 0x43c   : > { %v1736_v10 = vcombine.high %v1732_v3, %v1732_v3  ;;  %v1775_v14 = vcombine.high %v1771_v7, %v1771_v7  ;;  %v1752_v20 = vmul.f32 %v1750_v17, %v3548_v34  ;;  %v1755_v61 = vcombine.low %v1751_v62, %v1751_v62 }
 0x43e   : > { %1374 = vrot.lane.b32.xlu0 %v1369_v33, %s3070_s1  ;;  %1275 = vrot.lane.b32.xlu1 %v1272_v58, %s3075_s5  ;;  %v1756_v22 = vcombine.low %v1752_v20, %v1752_v20  ;;  %v3638_v33 = vpop.permute.xlu1 %1806  ;;  %v1791_v58 = vcombine.low %v3559_v40, %v3559_v40 }
 0x442   : > { %1336 = vrot.lane.b32.xlu1 %v1333_v59, %s3072_s17  ;;  %1431 = vrot.lane.b32.xlu0 %v3546_v31, %s3071_s9  ;;  %v2036_v31 = vld [vmem:[%s3824_s14] sm:$0xf]  ;;  %v3640_v34 = vpop.permute.xlu1 %1826 }
 0x446   : > { %1403 = vrot.lane.b32.xlu1 %v1401_v48, %s3073_s25  ;;  %1308 = vrot.lane.b32.xlu0 %v1303_v55, %s3074_s24 }
 0x44a   : > { %1759 = vrot.lane.b32.xlu1 %v1751_v62, %s3074_s24  ;;  %1304 = vrot.lane.b32.xlu0 %v1302_v63, %s3074_s24 }
 0x44e   : > { %1737 = vrot.lane.b32.xlu1 %v1732_v3, %s3075_s5  ;;  %1376 = vrot.lane.b32.xlu0 %v1373_v5, %s3070_s1 }
 0x452   : > { %1776 = vrot.lane.b32.xlu1 %v1771_v7, %s3072_s17  ;;  %1433 = vrot.lane.b32.xlu0 %v1430_v8, %s3071_s9 }
 0x456   : > { %1739 = vrot.lane.b32.xlu1 %v1736_v10, %s3075_s5  ;;  %1741 = vrot.lane.b32.xlu0 %v1733_v11, %s3075_s5  ;;  %s2643_s5 = sshll.u32 %s3868_s27, 6 }
 0x45a   : > { %1778 = vrot.lane.b32.xlu1 %v1775_v14, %s3072_s17  ;;  %1780 = vrot.lane.b32.xlu0 %v1772_v15, %s3072_s17 }
 0x45e   : > { %1845 = vrot.lane.b32.xlu1 %v1837_v18, %s3071_s9  ;;  %1824 = vrot.lane.b32.xlu0 %v1816_v19, %s3073_s25 }
 0x462   : > { %1822 = vrot.lane.b32.xlu1 %v1820_v21, %s3073_s25  ;;  %1761 = vrot.lane.b32.xlu0 %v1756_v22, %s3074_s24 }
 0x466   : > { %1978 = vperm.xlu1 %2806, %v1853_v23   ;;  %1802 = vrot.lane.b32.xlu0 %v3553_v38, %s3070_s1 }
 0x46a   : > { %1757 = vrot.lane.b32.xlu0 %v1755_v61, %s3074_s24  ;;  %2808 = vset.pattern.permute.xlu1 %v3062_v6 }
 0x46b   : > { %2005 = vperm.xlu1 %2808, %v1853_v23  }
 0x46e   : > { %1804 = vrot.lane.b32.xlu0 %v1801_v24, %s3070_s1 }
 0x46f   : > { %2009 = vperm.xlu1 %2808, %v1854_v26  }
 0x472   : > { %1843 = vrot.lane.b32.xlu0 %v1840_v25, %s3071_s9 }
 0x473   : > { %2809 = vset.pattern.permute.xlu1 %v3061_v1 }
 0x474   : > { %1993 = vperm.xlu1 %2809, %v1856_v29  }
 0x476   : > { %1841 = vrot.lane.b32.xlu0 %v3556_v39, %s3071_s9 }
 0x478   : > { %2811 = vset.pattern.permute.xlu1 %v3062_v6 }
 0x479   : > { %2017 = vperm.xlu1 %2811, %v1856_v29  }
 0x47a   : > { %1983 = vperm.xlu0 %2807, %v1854_v26  }
 0x47d   : > { %2812 = vset.pattern.permute.xlu1 %v3061_v1 }
 0x47e   : > { %1988 = vperm.xlu0 %2807, %v1855_v27   ;;  %2114 = vperm.xlu1 %2812, %v2036_v31  }
 0x482   : > { %2810 = vset.pattern.permute.xlu0 %v3062_v6 }
 0x483   : > { %2013 = vperm.xlu0 %2810, %v1855_v27  }
 0x487   : > { %2120 = vperm.xlu0 %2810, %v2036_v31  }
 0x48b   : > { %2813 = vset.pattern.permute.xlu0 %v3061_v1 }
 0x4a4   : > { %v1278_v35 = vpop.permute.xlu0 %1277  ;;  %v1307_v36 = vpop.permute.xlu1 %1306 }
 0x4a8   : > { %v1339_v37 = vpop.permute.xlu0 %1338  ;;  %v1274_v38 = vpop.permute.xlu1 %1273 }
 0x4ac   : > { %v1406_v39 = vpop.permute.xlu0 %1405  ;;  %v1335_v41 = vpop.permute.xlu1 %1334 }
 0x4ad   : > { %v1410_v42 = vsel %vm1294_vm6, %v1406_v39, %v1408_v30 }
 0x4ae   : > { %1414 = vst [vmem:[#allocation3 + $0x28] sm:$0xf0] %v1410_v42 }
 0x4b0   : > { %v1375_v43 = vpop.permute.xlu0 %1374  ;;  %v1276_v44 = vpop.permute.xlu1 %1275 }
 0x4b1   : > { %v1280_v45 = vsel %vm1279_vm1, %v1274_v38, %v1276_v44  ;;  %v1281_v46 = vsel %vm1279_vm1, %v1276_v44, %v1278_v35 }
 0x4b2   : > { %1284 = vst [vmem:[#allocation3] sm:$0xf] %v1280_v45  ;;  %1285 = vst [vmem:[#allocation3 + $0x8] sm:$0xf] %v1281_v46 }
 0x4b4   : > { %v1432_v47 = vpop.permute.xlu0 %1431  ;;  %v1337_v49 = vpop.permute.xlu1 %1336 }
 0x4b5   : > { %v1341_v50 = vsel %vm1340_vm0, %v1335_v41, %v1337_v49  ;;  %v1342_v51 = vsel %vm1340_vm0, %v1337_v49, %v1339_v37 }
 0x4b6   : > { %1345 = vst [vmem:[#allocation3 + $0x10] sm:$0xf] %v1341_v50  ;;  %1346 = vst [vmem:[#allocation3 + $0x18] sm:$0xf] %v1342_v51 }
 0x4b8   : > { %v1309_v52 = vpop.permute.xlu0 %1308  ;;  %v1404_v4 = vpop.permute.xlu1 %1403 }
 0x4b9   : > { %v1312_v53 = vsel %vm1310_vm2, %v1307_v36, %v1309_v52  ;;  %v1409_v54 = vsel %vm1294_vm6, %v1404_v4, %v1406_v39 }
 0x4ba   : > { %1316 = vst [vmem:[#allocation3 + $0x8] sm:$0xf0] %v1312_v53  ;;  %1413 = vst [vmem:[#allocation3 + $0x20] sm:$0xf0] %v1409_v54 }
 0x4bc   : > { %v1305_v56 = vpop.permute.xlu0 %1304  ;;  %v1760_v57 = vpop.permute.xlu1 %1759 }
 0x4bd   : > { %v1311_v59 = vsel %vm1310_vm2, %v1305_v56, %v1307_v36  ;;  %v1454_v2 = vld [vmem:[#allocation3 + $0x18] sm:$0xff]  ;;  %v1453_v48 = vld [vmem:[#allocation3 + $0x10] sm:$0xff] }
 0x4be   : > { %1315 = vst [vmem:[#allocation3] sm:$0xf0] %v1311_v59  ;;  %1794 = vst [vmem:[#allocation3 + $0x18] sm:$0xf0] %v3559_v40  ;;  %v1859_v59 = vld [vmem:[#allocation11 + $0x10] sm:$0xff] }
 0x4bf   : > { %1793 = vst [vmem:[#allocation3 + $0x10] sm:$0xf0] %v1791_v58  ;;  %v1858_v58 = vld [vmem:[#allocation11 + $0x8] sm:$0xff] }
 0x4c0   : > { %v1377_v55 = vpop.permute.xlu0 %1376  ;;  %v1738_v60 = vpop.permute.xlu1 %1737 }
 0x4c1   : > { %v1380_v62 = vsel %vm1325_vm9, %v1375_v43, %v1377_v55  ;;  %v1381_v63 = vsel %vm1325_vm9, %v1377_v55, %v1379_v28  ;;  %v1452_v3 = vld [vmem:[#allocation3 + $0x8] sm:$0xff]  ;;  %v1448_v55 = vld [vmem:[#allocation8 + $0x8] sm:$0xff] }
 0x4c2   : > { %1384 = vst [vmem:[#allocation3 + $0x20] sm:$0xf] %v1380_v62  ;;  %1385 = vst [vmem:[#allocation3 + $0x28] sm:$0xf] %v1381_v63  ;;  %v2662_v5 = vpack.c.bf16 %v1454_v2, %v1452_v3  ;;  %v1860_v2 = vld [vmem:[#allocation11 + $0x18] sm:$0xff] }
 0x4c3   : > { %v1450_v62 = vld [vmem:[#allocation8 + $0x18] sm:$0xff] }
 0x4c4   : > { %v1434_v7 = vpop.permute.xlu0 %1433  ;;  %2663 = vmatprep.subr.bf16.mxu0 %v2662_v5  ;;  %v1777_v8 = vpop.permute.xlu1 %1776 }
 0x4c5   : > { %v1437_v9 = vsel %vm1264_vm8, %v1432_v47, %v1434_v7  ;;  %v1438_v10 = vsel %vm1264_vm8, %v1434_v7, %v1436_v32  ;;  %v1451_v11 = vld [vmem:[#allocation3] sm:$0xff] }
 0x4c6   : > { %1441 = vst [vmem:[#allocation3 + $0x30] sm:$0xf] %v1437_v9  ;;  %1442 = vst [vmem:[#allocation3 + $0x38] sm:$0xf] %v1438_v10  ;;  %v2664_v40 = vpack.c.bf16 %v1453_v48, %v1451_v11  ;;  %v1447_v48 = vld [vmem:[#allocation8] sm:$0xff] }
 0x4c8   : > { %v1742_v13 = vpop.permute.xlu0 %1741  ;;  %2665 = vmatpush1.bf16.msra.mxu0 %v2664_v40  ;;  %v1740_v14 = vpop.permute.xlu1 %1739 }
 0x4c9   : > { %v1743_v15 = vsel %vm1279_vm1, %v1738_v60, %v1740_v14  ;;  %v1744_v16 = vsel %vm1279_vm1, %v1740_v14, %v1742_v13  ;;  %v1456_v19 = vld [vmem:[#allocation3 + $0x28] sm:$0xff]  ;;  %v1455_v23 = vld [vmem:[#allocation3 + $0x20] sm:$0xff]  ;;  %v1449_v60 = vld [vmem:[#allocation8 + $0x10] sm:$0xff] }
 0x4ca   : > { %1747 = vst [vmem:[#allocation3] sm:$0xf] %v1743_v15  ;;  %1748 = vst [vmem:[#allocation3 + $0x8] sm:$0xf] %v1744_v16 }
 0x4cc   : > { %v1781_v17 = vpop.permute.xlu0 %1780  ;;  %v1779_v18 = vpop.permute.xlu1 %1778 }
 0x4cd   : > { %v1782_v20 = vsel %vm1340_vm0, %v1777_v8, %v1779_v18  ;;  %v1783_v21 = vsel %vm1340_vm0, %v1779_v18, %v1781_v17  ;;  %v1458_v22 = vld [vmem:[#allocation3 + $0x38] sm:$0xf]  ;;  %v1457_v61 = vld [vmem:[#allocation3 + $0x30] sm:$0xf] }
 0x4ce   : > { %1786 = vst [vmem:[#allocation3 + $0x10] sm:$0xf] %v1782_v20  ;;  %1787 = vst [vmem:[#allocation3 + $0x18] sm:$0xf] %v1783_v21  ;;  %v2666_v24 = vpack.c.bf16 %v1458_v22, %v1456_v19  ;;  %v2669_v25 = vpack.c.bf16 %v1457_v61, %v1455_v23 }
 0x4d0   : > { %v1825_v26 = vpop.permute.xlu0 %1824  ;;  %2668 = vmatprep.subr.msk.bf16.mxu0 %vm3470_vm10, %v2666_v24  ;;  %v1846_v27 = vpop.permute.xlu1 %1845 }
 0x4d1   : > { %v1829_v28 = vsel %vm1294_vm6, %v1825_v26, %v3640_v34  ;;  %2671 = vmatpush1.bf16.msk.msra.mxu0 %vm3470_vm10, %v2669_v25 }
 0x4d2   : > { %1833 = vst [vmem:[#allocation3 + $0x28] sm:$0xf0] %v1829_v28 }
 0x4d4   : > { %v1762_v29 = vpop.permute.xlu0 %1761  ;;  %v1823_v30 = vpop.permute.xlu1 %1822  ;;  %2620 = vmatmul.mubr.msk.f32.vlgmr.msra.gmra.mrb[2].mxu0 %vm992_vm11, %v1447_v48 }
 0x4d5   : > { %v1764_v31 = vsel %vm1310_vm2, %v1760_v57, %v1762_v29  ;;  %v1828_v32 = vsel %vm1294_vm6, %v1823_v30, %v1825_v26  ;;  %v1864_v39 = vld [vmem:[#allocation3 + $0x18] sm:$0xff]  ;;  %v1863_v47 = vld [vmem:[#allocation3 + $0x10] sm:$0xff]  ;;  %1547 = vmatprep.mubr.f32.mxu0 %v3060_v0 }
 0x4d6   : > { %1768 = vst [vmem:[#allocation3 + $0x8] sm:$0xf0] %v1764_v31  ;;  %1832 = vst [vmem:[#allocation3 + $0x20] sm:$0xf0] %v1828_v32 }
 0x4d8   : > { %v1803_v35 = vpop.permute.xlu0 %1802  ;;  %2621 = vmatmul.mubr.msk.f32.gmra.mrb[4].mxu0 %vm992_vm11, %v1448_v55 }
 0x4d9   : > { %1553 = vmatprep.mubr.f32.mxu0 %v3060_v0 }
 0x4dc   : > { %v1758_v36 = vpop.permute.xlu0 %1757  ;;  %2622 = vmatmul.mubr.msk.f32.gmra.mrb[6].mxu0 %vm992_vm11, %v1449_v60 }
 0x4dd   : > { %v1763_v37 = vsel %vm1310_vm2, %v1758_v36, %v1760_v57  ;;  %v1862_v38 = vld [vmem:[#allocation3 + $0x8] sm:$0xff]  ;;  %1559 = vmatprep.mubr.f32.mxu0 %v3060_v0 }
 0x4de   : > { %1767 = vst [vmem:[#allocation3] sm:$0xf0] %v1763_v37  ;;  %v2672_v34 = vpack.c.bf16 %v1864_v39, %v1862_v38  ;;  %v1857_v57 = vld [vmem:[#allocation11] sm:$0xff] }
 0x4e0   : > { %v1805_v41 = vpop.permute.xlu0 %1804  ;;  %2673 = vmatprep.subr.bf16.mxu1 %v2672_v34  ;;  %2623 = vmatmul.mubr.msk.f32.gmra.mrb[8].mxu0 %vm992_vm11, %v1450_v62 }
 0x4e1   : > { %v1808_v42 = vsel %vm1325_vm9, %v1803_v35, %v1805_v41  ;;  %v1809_v43 = vsel %vm1325_vm9, %v1805_v41, %v3638_v33  ;;  %2105 = vmatprep.mubr.f32.mxu0 %v3060_v0 }
 0x4e2   : > { %1812 = vst [vmem:[#allocation3 + $0x20] sm:$0xf] %v1808_v42  ;;  %1813 = vst [vmem:[#allocation3 + $0x28] sm:$0xf] %v1809_v43 }
 0x4e4   : > { %v1844_v44 = vpop.permute.xlu0 %1843 }
 0x4e5   : > { %v1848_v45 = vsel %vm1264_vm8, %v1844_v44, %v1846_v27  ;;  %v1861_v46 = vld [vmem:[#allocation3] sm:$0xff]  ;;  %v1979_v63 = vpop.permute.xlu1 %1978 }
 0x4e6   : > { %1852 = vst [vmem:[#allocation3 + $0x38] sm:$0xf] %v1848_v45  ;;  %v2674_v49 = vpack.c.bf16 %v1863_v47, %v1861_v46 }
 0x4e8   : > { %v1842_v50 = vpop.permute.xlu0 %1841  ;;  %2675 = vmatpush1.bf16.msra.mxu1 %v2674_v49 }
 0x4e9   : > { %v1847_v51 = vsel %vm1264_vm8, %v1842_v50, %v1844_v44  ;;  %v1866_v52 = vld [vmem:[#allocation3 + $0x28] sm:$0xff]  ;;  %v1865_v33 = vld [vmem:[#allocation3 + $0x20] sm:$0xff] }
 0x4ea   : > { %1851 = vst [vmem:[#allocation3 + $0x30] sm:$0xf] %v1847_v51  ;;  %v2006_v3 = vpop.permute.xlu1 %2005  ;;  %v2037_v50 = vld [vmem:[#allocation12] sm:$0xf] }
 0x4ed   : > { %v1868_v4 = vld [vmem:[#allocation3 + $0x38] sm:$0xf] }
 0x4ee   : > { %v2676_v53 = vpack.c.bf16 %v1868_v4, %v1866_v52  ;;  %v2010_v11 = vpop.permute.xlu1 %2009 }
 0x4f0   : > { %2678 = vmatprep.subr.msk.bf16.mxu1 %vm3470_vm10, %v2676_v53 }
 0x4f1   : > { %v1867_v54 = vld [vmem:[#allocation3 + $0x30] sm:$0xf] }
 0x4f2   : > { %v2679_v56 = vpack.c.bf16 %v1867_v54, %v1865_v33 }
 0x4f3   : > { %v1994_v19 = vpop.permute.xlu1 %1993 }
 0x4f4   : > { %2681 = vmatpush1.bf16.msk.msra.mxu1 %vm3470_vm10, %v2679_v56 }
 0x4f7   : > { %2629 = vmatmul.mubr.msk.f32.vlgmr.msra.gmra.mrb[12].mxu1 %vm992_vm11, %v1857_v57 }
 0x4f8   : > { %1957 = vmatprep.mubr.f32.mxu1 %v3060_v0  ;;  %v2018_v35 = vpop.permute.xlu1 %2017 }
 0x4f9   : > { %v1984_v5 = vpop.permute.xlu0 %1983 }
 0x4fb   : > { %2630 = vmatmul.mubr.msk.f32.gmra.mrb[14].mxu1 %vm992_vm11, %v1858_v58  ;;  %v2191_v58 = vld [vmem:[#allocation2 + $0xc] sm:$0xf] }
 0x4fc   : > { %1963 = vmatprep.mubr.f32.mxu1 %v3060_v0  ;;  %2199 = vrot.lane.b32.xlu1 %v2191_v58, %s3063_s23 }
 0x4fd   : > { %v1989_v13 = vpop.permute.xlu0 %1988 }
 0x4ff   : > { %2631 = vmatmul.mubr.msk.f32.gmra.mrb[16].mxu1 %vm992_vm11, %v1859_v59  ;;  %v2823_v59 = vld [vmem:[#allocation2 + $0xc] ss:$0 sps:$4 sm:$0xff]  }
 0x500   : > { %1969 = vmatprep.mubr.f32.mxu1 %v3060_v0  ;;  %2217 = vrot.lane.b32.xlu1 %v2823_v59, %s3064_s29 }
 0x502   : > { %v2014_v29 = vpop.permute.xlu0 %2013 }
 0x503   : > { %2632 = vmatmul.mubr.msk.f32.gmra.mrb[18].mxu1 %vm992_vm11, %v1860_v2  ;;  %v2115_v2 = vpop.permute.xlu1 %2114 }
 0x506   : > { %v2121_v62 = vpop.permute.xlu0 %2120 }
 0x5a7   : > { %v3696_v51 = vpop.f32.mrb[2].mxu0 }
 0x5a8   : > { %v3698_v52 = vpop.f32.mrb[3].mxu0 }
 0x5ab   : > { %v3700_v4 = vpop.f32.mrb[4].mxu0 }
 0x5ac   : > { %v3702_v53 = vpop.f32.mrb[5].mxu0 }
 0x5af   : > { %v3704_v33 = vpop.f32.mrb[6].mxu0 }
 0x5b0   : > { %v3706_v54 = vpop.f32.mrb[7].mxu0 }
 0x5b3   : > { %v3708_v56 = vpop.f32.mrb[8].mxu0 }
 0x5b4   : > { %v3710_v57 = vpop.f32.mrb[9].mxu0 }
 0x5ca   : > { %v1953_v7 = vpop.f32.mrb[12].mxu1 }
 0x5cb   : > { %v1996_v8 = vmul.f32 %v1979_v63, %v1953_v7  ;;  %v1955_v9 = vpop.f32.mrb[13].mxu1 }
 0x5cc   : > { %v1997_v10 = vmul.f32 %v1979_v63, %v1955_v9 }
 0x5cd   : > { %v2020_v14 = vadd.f32 %v2006_v3, %v1996_v8 }
 0x5ce   : > { %v1959_v40 = vpop.f32.mrb[14].mxu1  ;;  %v2021_v17 = vadd.f32 %v2006_v3, %v1997_v10 }
 0x5cf   : > { %v1998_v15 = vmul.f32 %v1984_v5, %v1959_v40  ;;  %v1961_v16 = vpop.f32.mrb[15].mxu1  ;;  %v2028_v23 = vmax.f32 %v2020_v14, 0.0 }
 0x5d0   : > { %v1999_v18 = vmul.f32 %v1984_v5, %v1961_v16  ;;  %v2029_v26 = vmax.f32 %v2021_v17, 0.0  ;;  %v2226_v16 = vld [vmem:[#allocation2 + $0xc] sm:$0xf] }
 0x5d1   : > { %v2022_v20 = vadd.f32 %v2010_v11, %v1998_v15 }
 0x5d2   : > { %v2023_v21 = vadd.f32 %v2010_v11, %v1999_v18  ;;  %v1965_v22 = vpop.f32.mrb[16].mxu1 }
 0x5d3   : > { %v2030_v61 = vmax.f32 %v2022_v20, 0.0  ;;  %v2000_v24 = vmul.f32 %v1989_v13, %v1965_v22  ;;  %v1967_v25 = vpop.f32.mrb[17].mxu1  ;;  %v1445_v20 = vld [vmem:[%s3818_s8 + $0x10] sm:$0xff]  ;;  %v1446_v22 = vld [vmem:[%s3818_s8 + $0x18] sm:$0xff] }
 0x5d4   : > { %v2031_v27 = vmax.f32 %v2023_v21, 0.0  ;;  %v2001_v28 = vmul.f32 %v1989_v13, %v1967_v25  ;;  %v1444_v21 = vld [vmem:[%s3818_s8 + $0x8] sm:$0xff]  ;;  %v2245_v25 = vld [vmem:[%s3860_s26 + $0x18] sm:$0xff] }
 0x5d5   : > { %v2684_v30 = vpack.c.bf16 %v2030_v61, %v2028_v23  ;;  %v2024_v36 = vadd.f32 %v2014_v29, %v2000_v24  ;;  %v2243_v23 = vld [vmem:[%s3860_s26 + $0x8] sm:$0xff]  ;;  %v2242_v61 = vld [vmem:[%s3860_s26] sm:$0xff]  ;;  %v2244_v24 = vld [vmem:[%s3860_s26 + $0x10] sm:$0xff] }
 0x5d6   : > { %v1971_v31 = vpop.f32.mrb[18].mxu1  ;;  %v2682_v32 = vpack.c.bf16 %v2031_v27, %v2029_v26  ;;  %v2025_v39 = vadd.f32 %v2014_v29, %v2001_v28 }
 0x5d7   : > { %v2002_v37 = vmul.f32 %v1994_v19, %v1971_v31  ;;  %v1973_v38 = vpop.f32.mrb[19].mxu1  ;;  %v2032_v43 = vmax.f32 %v2024_v36, 0.0 }
 0x5d8   : > { %v2003_v34 = vmul.f32 %v1994_v19, %v1973_v38  ;;  %2683 = vmatprep.subr.bf16.mxu0 %v2682_v32  ;;  %v2033_v45 = vmax.f32 %v2025_v39, 0.0  ;;  %v1443_v19 = vld [vmem:[%s3818_s8] sm:$0xff] }
 0x5d9   : > { %v2026_v41 = vadd.f32 %v2018_v35, %v2002_v37  ;;  %2685 = vmatpush1.bf16.msra.mxu0 %v2684_v30 }
 0x5da   : > { %v2027_v42 = vadd.f32 %v2018_v35, %v2003_v34 }
 0x5db   : > { %v2034_v44 = vmax.f32 %v2026_v41, 0.0 }
 0x5dc   : > { %v2035_v46 = vmax.f32 %v2027_v42, 0.0 }
 0x5dd   : > { %v2688_v47 = vpack.c.bf16 %v2034_v44, %v2032_v43 }
 0x5de   : > { %v2686_v49 = vpack.c.bf16 %v2035_v46, %v2033_v45 }
 0x5e0   : > { %2687 = vmatprep.subr.bf16.mxu0 %v2686_v49 }
 0x5e1   : > { %2689 = vmatpush1.bf16.msra.mxu0 %v2688_v47 }
 0x5e4   : > { %2633 = vmatmul.mubr.msk.f32.vlgmr.msra.gmra.mrb[10].mxu0 %vm890_vm4, %v2037_v50 }
 0x5e5   : > { %2340 = vmatprep.mubr.f32.mxu0 %v3060_v0 }
 0x6b7   : > { %v2107_v48 = vpop.f32.mrb[10].mxu0 }
 0x6b8   : > { %v2117_v55 = vmul.f32 %v2115_v2, %v2107_v48  ;;  %v2109_v60 = vpop.f32.mrb[11].mxu0 }
 0x6b9   : > { %v2118_v63 = vmul.f32 %v2115_v2, %v2109_v60 }
 0x6ba   : > { %v2123_v3 = vadd.f32 %v2121_v62, %v2117_v55 }
 0x6bb   : > { %v2124_v5 = vadd.f32 %v2121_v62, %v2118_v63 }
 0x6bc   : > { %v2125_v7 = vmax.f32 %v2123_v3, 0.0 }
 0x6bd   : > { %v2126_v8 = vmax.f32 %v2124_v5, 0.0 }
 0x6be   : > { %v2829_v10 = vcombine.low %v2125_v7, %v2125_v7 }
 0x6bf   : > { %v2129_v9 = vcombine.low %v2125_v7, %v2126_v8  ;;  %v2830_v18 = vcombine.low %v2126_v8, %v2126_v8 }
 0x6c0   : > { %2188 = vst [vmem:[#allocation3 + $0x10] sm:$0xf0] %v2829_v10 }
 0x6c1   : > { %2131 = vst [vmem:[#allocation2 + $0x4] sm:$0xff] %v2129_v9  ;;  %2189 = vst [vmem:[#allocation3 + $0x18] sm:$0xf0] %v2129_v9 }
 0x6c8   : > { %v2149_v11 = vld [vmem:[#allocation2] sm:$0xff]  ;;  %v2133_v40 = vld [vmem:[#allocation2 + $0x8] sm:$0xf] }
 0x6c9   : > { %2157 = vrot.lane.b32.xlu1 %v2149_v11, %s3067_s20  ;;  %2141 = vrot.lane.b32.xlu0 %v2133_v40, %s3066_s18  ;;  %v2168_v13 = vld [vmem:[#allocation2 + $0x8] sm:$0xf]  ;;  %v2136_v14 = vcombine.high %v2149_v11, %v2149_v11  ;;  %v2153_v17 = vcombine.low %v2149_v11, %v2149_v11 }
 0x6ca   : > { %v2826_v15 = vld [vmem:[#allocation2 + $0x8] ss:$0 sps:$4 sm:$0xff]  }
 0x6cd   : > { %2176 = vrot.lane.b32.xlu0 %v2168_v13, %s3065_s21  ;;  %2137 = vrot.lane.b32.xlu1 %v2149_v11, %s3066_s18 }
 0x6d1   : > { %2215 = vrot.lane.b32.xlu0 %v2129_v9, %s3064_s29  ;;  %2172 = vrot.lane.b32.xlu1 %v2149_v11, %s3065_s21 }
 0x6d5   : > { %2159 = vrot.lane.b32.xlu0 %v2826_v15, %s3067_s20  ;;  %2139 = vrot.lane.b32.xlu1 %v2136_v14, %s3066_s18  ;;  %v2246_v15 = vld [vmem:[#allocation14] sm:$0xff] }
 0x6d9   : > { %2195 = vrot.lane.b32.xlu0 %v2129_v9, %s3063_s23  ;;  %2174 = vrot.lane.b32.xlu1 %v2136_v14, %s3065_s21  ;;  %s3865_s21 = sld [smem:[#allocation25_spill]] }
 0x6dd   : > { %2155 = vrot.lane.b32.xlu0 %v2153_v17, %s3067_s20  ;;  %2234 = vrot.lane.b32.xlu1 %v2226_v16, %s3068_s16  ;;  %v2247_v16 = vld [vmem:[#allocation14 + $0x8] sm:$0xff]  ;;  %v2248_v17 = vld [vmem:[#allocation14 + $0x10] sm:$0xff] }
 0x6df   : > { %s3791_s20 = scalar_lea.vmem %s3865_s21, %s2643_s5 }
 0x6e1   : > { %2197 = vrot.lane.b32.xlu0 %v2830_v18, %s3063_s23  ;;  %2213 = vrot.lane.b32.xlu1 %v2829_v10, %s3064_s29 }
 0x6e5   : > { %2232 = vrot.lane.b32.xlu0 %v2830_v18, %s3068_s16  ;;  %1568 = vperm.xlu1 %2812, %v1443_v19   ;;  %v2249_v18 = vld [vmem:[#allocation14 + $0x18] sm:$0xff] }
 0x6e9   : > { %2230 = vrot.lane.b32.xlu0 %v2129_v9, %s3068_s16  ;;  %1578 = vperm.xlu1 %2812, %v1445_v20  }
 0x6ed   : > { %1573 = vperm.xlu0 %2813, %v1444_v21   ;;  %1583 = vperm.xlu1 %2812, %v1446_v22  }
 0x6f1   : > { %2372 = vperm.xlu0 %2813, %v2243_v23   ;;  %2814 = vset.pattern.permute.xlu1 %v3062_v6 }
 0x6f2   : > { %1599 = vperm.xlu1 %2814, %v1444_v21  }
 0x6f5   : > { %2816 = vset.pattern.permute.xlu0 %v3062_v6 }
 0x6f6   : > { %1595 = vperm.xlu0 %2816, %v1443_v19   ;;  %1603 = vperm.xlu1 %2814, %v1445_v20  }
 0x6fa   : > { %1607 = vperm.xlu0 %2816, %v1446_v22   ;;  %2815 = vset.pattern.permute.xlu1 %v3061_v1  ;;  %v2200_v1 = vpop.permute.xlu1 %2199 }
 0x6fb   : > { %2367 = vperm.xlu1 %2815, %v2242_v61  }
 0x6fe   : > { %2394 = vperm.xlu0 %2816, %v2242_v61   ;;  %v2218_v26 = vpop.permute.xlu1 %2217 }
 0x6ff   : > { %2377 = vperm.xlu1 %2815, %v2244_v24  }
 0x702   : > { %2406 = vperm.xlu0 %2816, %v2245_v25  }
 0x703   : > { %2382 = vperm.xlu1 %2815, %v2245_v25  }
 0x707   : > { %2817 = vset.pattern.permute.xlu1 %v3062_v6 }
 0x708   : > { %2398 = vperm.xlu1 %2817, %v2243_v23  }
 0x70c   : > { %2402 = vperm.xlu1 %2817, %v2244_v24  }
 0x73b   : > { %v2142_v27 = vpop.permute.xlu0 %2141  ;;  %v2158_v28 = vpop.permute.xlu1 %2157 }
 0x73f   : > { %v2177_v29 = vpop.permute.xlu0 %2176  ;;  %v2138_v30 = vpop.permute.xlu1 %2137 }
 0x743   : > { %v2216_v31 = vpop.permute.xlu0 %2215  ;;  %v2173_v32 = vpop.permute.xlu1 %2172 }
 0x744   : > { %v2220_v35 = vsel %vm951_vm3, %v2216_v31, %v2218_v26 }
 0x745   : > { %2224 = vst [vmem:[#allocation3 + $0x28] sm:$0xf0] %v2220_v35 }
 0x747   : > { %v2160_v36 = vpop.permute.xlu0 %2159  ;;  %v2140_v37 = vpop.permute.xlu1 %2139 }
 0x748   : > { %v2162_v38 = vsel %vm890_vm4, %v2158_v28, %v2160_v36  ;;  %v2143_v39 = vsel %vm871_vm5, %v2138_v30, %v2140_v37  ;;  %v2144_v6 = vsel %vm871_vm5, %v2140_v37, %v2142_v27  ;;  %vm3862_vm5 = vmmov %vm3861_vm12 }
 0x749   : > { %2166 = vst [vmem:[#allocation3 + $0x8] sm:$0xf0] %v2162_v38  ;;  %2147 = vst [vmem:[#allocation3] sm:$0xf] %v2143_v39 }
 0x74a   : > { %2148 = vst [vmem:[#allocation3 + $0x8] sm:$0xf] %v2144_v6 }
 0x74b   : > { %v2196_v34 = vpop.permute.xlu0 %2195  ;;  %v2175_v41 = vpop.permute.xlu1 %2174 }
 0x74c   : > { %v2178_v42 = vsel %vm908_vm7, %v2173_v32, %v2175_v41  ;;  %v2179_v43 = vsel %vm908_vm7, %v2175_v41, %v2177_v29  ;;  %vm3863_vm7 = vcmask 654336  }
 0x74d   : > { %2182 = vst [vmem:[#allocation3 + $0x10] sm:$0xf] %v2178_v42  ;;  %2183 = vst [vmem:[#allocation3 + $0x18] sm:$0xf] %v2179_v43 }
 0x74f   : > { %v2156_v44 = vpop.permute.xlu0 %2155  ;;  %v2235_v45 = vpop.permute.xlu1 %2234 }
 0x750   : > { %v2161_v46 = vsel %vm890_vm4, %v2156_v44, %v2158_v28  ;;  %vm3864_vm4 = vmmov %vm3863_vm7 }
 0x751   : > { %2165 = vst [vmem:[#allocation3] sm:$0xf0] %v2161_v46  ;;  %v2251_v2 = vld [vmem:[#allocation3 + $0x8] sm:$0xff] }
 0x753   : > { %v2198_v47 = vpop.permute.xlu0 %2197  ;;  %v2214_v49 = vpop.permute.xlu1 %2213 }
 0x754   : > { %v2201_v50 = vsel %vm3861_vm12, %v2196_v34, %v2198_v47  ;;  %v2202_v58 = vsel %vm3862_vm5, %v2198_v47, %v2200_v1  ;;  %v2219_v59 = vsel %vm951_vm3, %v2214_v49, %v2216_v31  ;;  %v2253_v48 = vld [vmem:[#allocation3 + $0x18] sm:$0xff]  ;;  %v2252_v3 = vld [vmem:[#allocation3 + $0x10] sm:$0xff] }
 0x755   : > { %2205 = vst [vmem:[#allocation3 + $0x20] sm:$0xf] %v2201_v50  ;;  %2206 = vst [vmem:[#allocation3 + $0x28] sm:$0xf] %v2202_v58  ;;  %v2690_v55 = vpack.c.bf16 %v2253_v48, %v2251_v2 }
 0x756   : > { %2223 = vst [vmem:[#allocation3 + $0x20] sm:$0xf0] %v2219_v59 }
 0x757   : > { %v2233_v60 = vpop.permute.xlu0 %2232  ;;  %2691 = vmatprep.subr.bf16.mxu0 %v2690_v55 }
 0x758   : > { %v2237_v62 = vsel %vm3863_vm7, %v2233_v60, %v2235_v45  ;;  %v2250_v63 = vld [vmem:[#allocation3] sm:$0xff] }
 0x759   : > { %2241 = vst [vmem:[#allocation3 + $0x38] sm:$0xf] %v2237_v62  ;;  %v2692_v5 = vpack.c.bf16 %v2252_v3, %v2250_v63 }
 0x75b   : > { %v2231_v7 = vpop.permute.xlu0 %2230  ;;  %2693 = vmatpush1.bf16.msra.mxu0 %v2692_v5 }
 0x75c   : > { %v2236_v8 = vsel %vm3864_vm4, %v2231_v7, %v2233_v60  ;;  %v2255_v9 = vld [vmem:[#allocation3 + $0x28] sm:$0xff] }
 0x75d   : > { %2240 = vst [vmem:[#allocation3 + $0x30] sm:$0xf] %v2236_v8  ;;  %v2254_v40 = vld [vmem:[#allocation3 + $0x20] sm:$0xff] }
 0x760   : > { %v2257_v10 = vld [vmem:[#allocation3 + $0x38] sm:$0xf] }
 0x761   : > { %v2694_v11 = vpack.c.bf16 %v2257_v10, %v2255_v9 }
 0x763   : > { %2696 = vmatprep.subr.msk.bf16.mxu0 %vm3470_vm10, %v2694_v11 }
 0x764   : > { %v2256_v13 = vld [vmem:[#allocation3 + $0x30] sm:$0xf]  ;;  %v1569_v12 = vpop.permute.xlu1 %1568 }
 0x765   : > { %v2697_v14 = vpack.c.bf16 %v2256_v13, %v2254_v40  ;;  %v1586_v28 = vmul.f32 %v1569_v12, %v3696_v51 }
 0x767   : > { %2699 = vmatpush1.bf16.msk.msra.mxu0 %vm3470_vm10, %v2697_v14 }
 0x768   : > { %v1579_v19 = vpop.permute.xlu1 %1578 }
 0x769   : > { %v1590_v50 = vmul.f32 %v1579_v19, %v3704_v33  ;;  %v1591_v59 = vmul.f32 %v1579_v19, %v3706_v54 }
 0x76a   : > { %2636 = vmatmul.mubr.msk.f32.vlgmr.msra.gmra.mrb[12].mxu0 %vm992_vm11, %v2246_v15 }
 0x76b   : > { %2346 = vmatprep.mubr.f32.mxu0 %v3060_v0 }
 0x76c   : > { %v1584_v20 = vpop.permute.xlu1 %1583  ;;  %v1574_v22 = vpop.permute.xlu0 %1573 }
 0x76d   : > { %v1588_v39 = vmul.f32 %v1574_v22, %v3700_v4  ;;  %v1589_v34 = vmul.f32 %v1574_v22, %v3702_v53  ;;  %v1592_v11 = vmul.f32 %v1584_v20, %v3708_v56  ;;  %v1593_v13 = vmul.f32 %v1584_v20, %v3710_v57 }
 0x76e   : > { %2637 = vmatmul.mubr.msk.f32.gmra.mrb[14].mxu0 %vm992_vm11, %v2247_v16 }
 0x76f   : > { %2352 = vmatprep.mubr.f32.mxu0 %v3060_v0 }
 0x770   : > { %v2373_v61 = vpop.permute.xlu0 %2372 }
 0x771   : > { %v1600_v21 = vpop.permute.xlu1 %1599 }
 0x772   : > { %2638 = vmatmul.mubr.msk.f32.gmra.mrb[16].mxu0 %vm992_vm11, %v2248_v17  ;;  %v1612_v43 = vadd.f32 %v1600_v21, %v1588_v39  ;;  %v1613_v46 = vadd.f32 %v1600_v21, %v1589_v34 }
 0x773   : > { %2358 = vmatprep.mubr.f32.mxu0 %v3060_v0  ;;  %v1587_v0 = vmul.f32 %v1569_v12, %v3698_v52 }
 0x774   : > { %v1620_v62 = vmax.f32 %v1612_v43, 0.0  ;;  %v1621_v8 = vmax.f32 %v1613_v46, 0.0 }
 0x775   : > { %v1604_v23 = vpop.permute.xlu1 %1603  ;;  %v1596_v25 = vpop.permute.xlu0 %1595 }
 0x776   : > { %2639 = vmatmul.mubr.msk.f32.gmra.mrb[18].mxu0 %vm992_vm11, %v2249_v18  ;;  %v1610_v30 = vadd.f32 %v1596_v25, %v1586_v28  ;;  %v1611_v35 = vadd.f32 %v1596_v25, %v1587_v0  ;;  %v1614_v63 = vadd.f32 %v1604_v23, %v1590_v50  ;;  %v1615_v9 = vadd.f32 %v1604_v23, %v1591_v59 }
 0x778   : > { %v1618_v51 = vmax.f32 %v1610_v30, 0.0  ;;  %v1619_v47 = vmax.f32 %v1611_v35, 0.0  ;;  %v1622_v17 = vmax.f32 %v1614_v63, 0.0  ;;  %v1623_v22 = vmax.f32 %v1615_v9, 0.0 }
 0x779   : > { %v1608_v26 = vpop.permute.xlu0 %1607 }
 0x77a   : > { %v2368_v24 = vpop.permute.xlu1 %2367  ;;  %v1616_v18 = vadd.f32 %v1608_v26, %v1592_v11  ;;  %v1617_v23 = vadd.f32 %v1608_v26, %v1593_v13 }
 0x77c   : > { %v1624_v28 = vmax.f32 %v1616_v18, 0.0 }
 0x77d   : > { %v2395_v37 = vpop.permute.xlu0 %2394 }
 0x77e   : > { %v2378_v1 = vpop.permute.xlu1 %2377 }
 0x781   : > { %v2407_v56 = vpop.permute.xlu0 %2406 }
 0x782   : > { %v3781_v27 = vpop.permute.xlu1 %2382 }
 0x787   : > { %v2399_v38 = vpop.permute.xlu1 %2398 }
 0x78b   : > { %v2403_v60 = vpop.permute.xlu1 %2402 }
 0x83d   : > { %v2342_v29 = vpop.f32.mrb[12].mxu0 }
 0x83e   : > { %v2385_v31 = vmul.f32 %v2368_v24, %v2342_v29  ;;  %v2344_v32 = vpop.f32.mrb[13].mxu0  ;;  %v1625_v29 = vmax.f32 %v1617_v23, 0.0 }
 0x83f   : > { %v2386_v36 = vmul.f32 %v2368_v24, %v2344_v32 }
 0x840   : > { %v2409_v6 = vadd.f32 %v2395_v37, %v2385_v31 }
 0x841   : > { %v2410_v41 = vadd.f32 %v2395_v37, %v2386_v36  ;;  %v2348_v42 = vpop.f32.mrb[14].mxu0 }
 0x842   : > { %v2417_v44 = vmax.f32 %v2409_v6, 0.0  ;;  %v2387_v52 = vmul.f32 %v2373_v61, %v2348_v42  ;;  %v2350_v45 = vpop.f32.mrb[15].mxu0 }
 0x843   : > { %v2418_v49 = vmax.f32 %v2410_v41, 0.0  ;;  %v2388_v4 = vmul.f32 %v2373_v61, %v2350_v45 }
 0x844   : > { %v2433_v53 = vadd.f32 %v2417_v44, %v1618_v51  ;;  %v2411_v58 = vadd.f32 %v2399_v38, %v2387_v52 }
 0x845   : > { %v2434_v2 = vadd.f32 %v2418_v49, %v1619_v47  ;;  %v2412_v48 = vadd.f32 %v2399_v38, %v2388_v4  ;;  %v2354_v55 = vpop.f32.mrb[16].mxu0 }
 0x846   : > { %2441 = vst [vmem:[%s3791_s20] sm:$0xff] %v2433_v53  ;;  %v2419_v3 = vmax.f32 %v2411_v58, 0.0  ;;  %v2389_v5 = vmul.f32 %v2378_v1, %v2354_v55  ;;  %v2356_v7 = vpop.f32.mrb[17].mxu0 }
 0x847   : > { %2442 = vst [vmem:[%s3791_s20 + $0x8] sm:$0xff] %v2434_v2  ;;  %v2420_v33 = vmax.f32 %v2412_v48, 0.0  ;;  %v2390_v10 = vmul.f32 %v2378_v1, %v2356_v7 }
 0x848   : > { %v2435_v54 = vadd.f32 %v2419_v3, %v1620_v62  ;;  %v2413_v40 = vadd.f32 %v2403_v60, %v2389_v5 }
 0x849   : > { %v2436_v14 = vadd.f32 %v2420_v33, %v1621_v8  ;;  %v2414_v15 = vadd.f32 %v2403_v60, %v2390_v10  ;;  %v2360_v16 = vpop.f32.mrb[18].mxu0 }
 0x84a   : > { %2443 = vst [vmem:[%s3791_s20 + $0x10] sm:$0xff] %v2435_v54  ;;  %v2421_v12 = vmax.f32 %v2413_v40, 0.0  ;;  %v2391_v19 = vmul.f32 %v3781_v27, %v2360_v16  ;;  %v2362_v21 = vpop.f32.mrb[19].mxu0 }
 0x84b   : > { %2444 = vst [vmem:[%s3791_s20 + $0x18] sm:$0xff] %v2436_v14  ;;  %v2422_v61 = vmax.f32 %v2414_v15, 0.0  ;;  %v2392_v57 = vmul.f32 %v3781_v27, %v2362_v21 }
 0x84c   : > { %v2437_v20 = vadd.f32 %v2421_v12, %v1622_v17  ;;  %v2415_v24 = vadd.f32 %v2407_v56, %v2391_v19 }
 0x84d   : > { %v2438_v25 = vadd.f32 %v2422_v61, %v1623_v22  ;;  %v2416_v1 = vadd.f32 %v2407_v56, %v2392_v57 }
 0x84e   : > { %2445 = vst [vmem:[%s3791_s20 + $0x20] sm:$0xff] %v2437_v20  ;;  %v2423_v0 = vmax.f32 %v2415_v24, 0.0 }
 0x84f   : > { %2446 = vst [vmem:[%s3791_s20 + $0x28] sm:$0xff] %v2438_v25  ;;  %v2424_v30 = vmax.f32 %v2416_v1, 0.0 }
 0x850   : > { %v2439_v31 = vadd.f32 %v2423_v0, %v1624_v28 }
 0x851   : > { %v2440_v32 = vadd.f32 %v2424_v30, %v1625_v29 }
 0x852   : > { %2447 = vst [vmem:[%s3791_s20 + $0x30] sm:$0xff] %v2439_v31 }
 0x853   : > { %2448 = vst [vmem:[%s3791_s20 + $0x38] sm:$0xff] %v2440_v32 }
 0x854 PF: > { %s3866_s27 = sld [smem:[#allocation19_spill]] }
 0x85a   : > { %s31_s24 = sadd.s32 1, %s3866_s27  }
 0x85b   : > { %p28_p11 = scmp.ge.s32.totalorder %s31_s24, 4  }
 0x85d   :  { %30 = sbr.rel (!%p28_p11) target bundleno = 11 (0xb), region = 147 }
 0x864   :  { %2470 = vsyncpa [#allocation5], 1 }
 0x865   :  { %2472 = vsyncpa [#allocation5 + $0x1], 1 }
 0x866   :  { %2473 = vsyncpa [#allocation7], 1 }
 0x867   :  { %2474 = vsyncpa [#allocation10], 1 }
 0x868   :  { %2475 = vsyncpa [#allocation13], 1 }

</bundles_post_ra>
